<compile_context>
chip_gen: v5e
topology: v5e:2x2
jax: 0.10.0
libtpu: 0.0.40
codegen_flags: <defaults>
</compile_context>

<pallas_src>
import functools

import jax
import jax.numpy as jnp
from jax.experimental import pallas as pl
from jax.experimental.pallas import tpu as pltpu

PAD = 128  # lane width: every feature dimension is zero-padded to this


# ---------------------------------------------------------------------------
# Pallas kernel: full forward pass for one chunk of graphs (R = 128 rows).
#   conv1 (SAGEConv, mean aggr):  h = relu( [A_mean@x , x] @ W_cat + bl )
#   conv2 (GCNConv):              h = relu( A_gcn @ (h @ W2) + b2 )
#   conv3 (GCNConv):              h = relu( A_gcn @ (h @ W3) + b3 )
#   fc1, fc2:                     h = relu( h @ Wf + bf )
#   out:                          logits = h @ Wo + bo
# ---------------------------------------------------------------------------
def _gnn_kernel(a_mean_ref, a_gcn_ref, x_ref,
                wcat_ref, bl_ref,
                w2_ref, b2_ref,
                w3_ref, b3_ref,
                wf1_ref, bf1_ref,
                wf2_ref, bf2_ref,
                wo_ref, bo_ref,
                out_ref, cat_ref):
    bf16 = jnp.bfloat16
    f32 = jnp.float32

    x = x_ref[...]                                            # [R, PAD] bf16

    # --- SAGEConv (mean aggregation) with fused lin_l / lin_r matmul ---
    agg = jnp.dot(a_mean_ref[...], x, preferred_element_type=f32)
    cat_ref[:, 0:PAD] = agg.astype(bf16)                      # aggregated part
    cat_ref[:, PAD:2 * PAD] = x                               # root part
    h = jnp.dot(cat_ref[...], wcat_ref[...],
                preferred_element_type=f32) + bl_ref[...]
    h = jnp.maximum(h, 0.0).astype(bf16)

    a_gcn = a_gcn_ref[...]

    # --- GCNConv #1 ---
    t = jnp.dot(h, w2_ref[...], preferred_element_type=f32).astype(bf16)
    h = jnp.dot(a_gcn, t, preferred_element_type=f32) + b2_ref[...]
    h = jnp.maximum(h, 0.0).astype(bf16)

    # --- GCNConv #2 ---
    t = jnp.dot(h, w3_ref[...], preferred_element_type=f32).astype(bf16)
    h = jnp.dot(a_gcn, t, preferred_element_type=f32) + b3_ref[...]
    h = jnp.maximum(h, 0.0).astype(bf16)

    # --- fc1 ---
    h = jnp.dot(h, wf1_ref[...], preferred_element_type=f32) + bf1_ref[...]
    h = jnp.maximum(h, 0.0).astype(bf16)

    # --- fc2 ---
    h = jnp.dot(h, wf2_ref[...], preferred_element_type=f32) + bf2_ref[...]
    h = jnp.maximum(h, 0.0).astype(bf16)

    # --- out (lane-dense f32 store) ---
    out_ref[...] = (jnp.dot(h, wo_ref[...], preferred_element_type=f32)
                    + bo_ref[...])


# ---------------------------------------------------------------------------
# Graph preprocessing (hoisted: done once per static graph, not per forward).
# ---------------------------------------------------------------------------
def build_prop_matrices(edge_index, n):
    """Dense propagation matrices for one graph from edge_index [2, E] (src->dst)."""
    src = edge_index[0]
    dst = edge_index[1]
    ones = jnp.ones(src.shape[0], dtype=jnp.float32)

    # adj[i, j] = #edges j -> i  (messages aggregated at target i).
    adj = jnp.zeros((n, n), jnp.float32).at[dst, src].add(ones)

    # SAGE mean-aggregation matrix.
    deg = adj.sum(axis=1)
    a_mean = adj / jnp.maximum(deg, 1.0)[:, None]

    # GCN symmetric normalization with self-loops: D^{-1/2}(A + I)D^{-1/2}.
    adj_sl = adj + jnp.eye(n, dtype=jnp.float32)
    deg_sl = adj_sl.sum(axis=1)
    dinv = 1.0 / jnp.sqrt(jnp.maximum(deg_sl, 1.0))
    a_gcn = dinv[:, None] * adj_sl * dinv[None, :]

    return a_mean, a_gcn


def block_diag_chunks(a, graphs_per_chunk):
    """[B, N, N] per-graph matrices -> [G*R, R] per-chunk block-diagonal (R = gpc*N)."""
    bsz, n, _ = a.shape
    assert bsz % graphs_per_chunk == 0
    g = bsz // graphs_per_chunk
    r = graphs_per_chunk * n
    a = a.reshape(g, graphs_per_chunk, n, n)
    eye = jnp.eye(graphs_per_chunk, dtype=a.dtype)
    bd = jnp.einsum('gipq,ij->gipjq', a, eye)        # diag blocks = per-graph A
    return bd.reshape(g * r, r)


# ---------------------------------------------------------------------------
# Parameters (padded to 128 lanes; matmul weights in bf16, biases in f32).
# ---------------------------------------------------------------------------
def init_params(key, in_features, num_features, hidden_size):
    h2 = 2 * hidden_size
    out_dim = 4 * num_features
    assert max(in_features, h2, hidden_size, out_dim) <= PAD
    keys = jax.random.split(key, 7)

    def lin(k, fan_in, fan_out):
        scale = 1.0 / jnp.sqrt(jnp.float32(fan_in))
        w = jax.random.uniform(k, (fan_in, fan_out), jnp.float32, -scale, scale)
        b = jnp.zeros((fan_out,), jnp.float32)
        return w, b

    wl, bl = lin(keys[0], in_features, h2)      # SAGE lin_l (aggregated) + bias
    wr, _ = lin(keys[1], in_features, h2)       # SAGE lin_r (root), no bias
    w2, b2 = lin(keys[2], h2, h2)               # GCNConv 1
    w3, b3 = lin(keys[3], h2, hidden_size)      # GCNConv 2
    wf1, bf1 = lin(keys[4], hidden_size, hidden_size)
    wf2, bf2 = lin(keys[5], hidden_size, hidden_size)
    wo, bo = lin(keys[6], hidden_size, out_dim)

    def pad_w(w):
        fi, fo = w.shape
        return jnp.zeros((PAD, PAD), jnp.float32).at[:fi, :fo].set(w)

    def pad_b(b):
        return jnp.zeros((1, PAD), jnp.float32).at[0, :b.shape[0]].set(b)

    # Fused SAGE weight: rows [0:PAD) multiply aggregated features,
    # rows [PAD:2*PAD) multiply root features.
    w_cat = jnp.zeros((2 * PAD, PAD), jnp.float32)
    w_cat = w_cat.at[:in_features, :h2].set(wl)
    w_cat = w_cat.at[PAD:PAD + in_features, :h2].set(wr)

    bf = lambda a: a.astype(jnp.bfloat16)
    return dict(
        w_cat=bf(w_cat), bl=pad_b(bl),
        w2=bf(pad_w(w2)), b2=pad_b(b2),
        w3=bf(pad_w(w3)), b3=pad_b(b3),
        wf1=bf(pad_w(wf1)), bf1=pad_b(bf1),
        wf2=bf(pad_w(wf2)), bf2=pad_b(bf2),
        wo=bf(pad_w(wo)), bo=pad_b(bo),
    )


# ---------------------------------------------------------------------------
# Batched forward: B graphs per call, processed in chunks of `graphs_per_chunk`.
# a_mean_bd / a_gcn_bd are the precomputed per-chunk block-diagonal matrices
# (built once from edge_index via build_prop_matrices + block_diag_chunks).
# Per-graph output logits[b] matches the PyTorch module's forward.
# ---------------------------------------------------------------------------
def sequence_prediction_forward(params, x, a_mean_bd, a_gcn_bd,
                                *, num_features, graphs_per_chunk):
    bsz, n, fin = x.shape
    assert n == num_features, "final view() requires num_nodes == num_features"
    assert bsz % graphs_per_chunk == 0
    g = bsz // graphs_per_chunk
    r = graphs_per_chunk * n
    assert a_mean_bd.shape == (g * r, r)
    assert a_gcn_bd.shape == (g * r, r)

    # Lane-pad node features to 128 and cast to bf16 for the MXU.
    xp = jnp.pad(x.reshape(bsz * n, fin),
                 ((0, 0), (0, PAD - fin))).astype(jnp.bfloat16)

    a_spec = pl.BlockSpec((r, r), lambda i: (i, 0))
    x_spec = pl.BlockSpec((r, PAD), lambda i: (i, 0))
    wcat_spec = pl.BlockSpec((2 * PAD, PAD), lambda i: (0, 0))
    w_spec = pl.BlockSpec((PAD, PAD), lambda i: (0, 0))
    b_spec = pl.BlockSpec((1, PAD), lambda i: (0, 0))
    out_spec = pl.BlockSpec((r, PAD), lambda i: (i, 0))

    out_padded = pl.pallas_call(
        _gnn_kernel,
        out_shape=jax.ShapeDtypeStruct((bsz * n, PAD), jnp.float32),
        grid=(g,),
        in_specs=[a_spec, a_spec, x_spec,
                  wcat_spec, b_spec,
                  w_spec, b_spec,
                  w_spec, b_spec,
                  w_spec, b_spec,
                  w_spec, b_spec,
                  w_spec, b_spec],
        out_specs=out_spec,
        scratch_shapes=[pltpu.VMEM((r, 2 * PAD), jnp.bfloat16)],
        compiler_params=pltpu.CompilerParams(
            dimension_semantics=("parallel",)),
    )(a_mean_bd, a_gcn_bd, xp,
      params["w_cat"], params["bl"],
      params["w2"], params["b2"],
      params["w3"], params["b3"],
      params["wf1"], params["bf1"],
      params["wf2"], params["bf2"],
      params["wo"], params["bo"])

    out_dim = 4 * num_features
    logits = out_padded[:, :out_dim]                      # drop lane padding
    # Per-graph logits.view(num_features, 4, num_features)
    return logits.reshape(bsz, num_features, 4, num_features)


if __name__ == "__main__":
    num_features = 8       # == num_nodes per graph (required by the final view)
    in_features = 8        # lazily-inferred input feature dim of SAGEConv
    hidden_size = 32
    batch_graphs = 32      # graphs stacked per forward
    graphs_per_chunk = 16  # 16 graphs * 8 nodes = 128 sublane rows per grid step

    key = jax.random.PRNGKey(0)
    k_x, k_p = jax.random.split(key)

    n = num_features
    # Deterministic bidirectional ring graph, shared by every graph in the batch.
    src = jnp.concatenate([jnp.arange(n), (jnp.arange(n) + 1) % n])
    dst = jnp.concatenate([(jnp.arange(n) + 1) % n, jnp.arange(n)])
    edge_index = jnp.stack([src, dst]).astype(jnp.int32)

    # Hoisted graph preprocessing (static graph): done once, outside the forward.
    a_mean, a_gcn = build_prop_matrices(edge_index, n)
    a_mean_b = jnp.broadcast_to(a_mean, (batch_graphs, n, n))
    a_gcn_b = jnp.broadcast_to(a_gcn, (batch_graphs, n, n))
    a_mean_bd = block_diag_chunks(a_mean_b, graphs_per_chunk).astype(jnp.bfloat16)
    a_gcn_bd = block_diag_chunks(a_gcn_b, graphs_per_chunk).astype(jnp.bfloat16)

    x = jax.random.normal(k_x, (batch_graphs, n, in_features), jnp.float32)
    params = init_params(k_p, in_features, num_features, hidden_size)

    fwd = jax.jit(functools.partial(sequence_prediction_forward,
                                    num_features=num_features,
                                    graphs_per_chunk=graphs_per_chunk))
    logits = fwd(params, x, a_mean_bd, a_gcn_bd)
    jax.block_until_ready(logits)

    assert logits.shape == (batch_graphs, num_features, 4, num_features)
    assert bool(jnp.all(jnp.isfinite(logits)))
    print("KERNEL_OK")
</pallas_src>

<mosaic_0001>
module attributes {stable_mosaic.version = 11 : i64} {
  func.func @_gnn_kernel(%arg0: i32, %arg1: memref<128x128xbf16, #tpu.memory_space<vmem>>, %arg2: memref<128x128xbf16, #tpu.memory_space<vmem>>, %arg3: memref<128x128xbf16, #tpu.memory_space<vmem>>, %arg4: memref<256x128xbf16, #tpu.memory_space<vmem>>, %arg5: memref<1x128xf32, #tpu.memory_space<vmem>>, %arg6: memref<128x128xbf16, #tpu.memory_space<vmem>>, %arg7: memref<1x128xf32, #tpu.memory_space<vmem>>, %arg8: memref<128x128xbf16, #tpu.memory_space<vmem>>, %arg9: memref<1x128xf32, #tpu.memory_space<vmem>>, %arg10: memref<128x128xbf16, #tpu.memory_space<vmem>>, %arg11: memref<1x128xf32, #tpu.memory_space<vmem>>, %arg12: memref<128x128xbf16, #tpu.memory_space<vmem>>, %arg13: memref<1x128xf32, #tpu.memory_space<vmem>>, %arg14: memref<128x128xbf16, #tpu.memory_space<vmem>>, %arg15: memref<1x128xf32, #tpu.memory_space<vmem>>, %arg16: memref<128x128xf32, #tpu.memory_space<vmem>>, %arg17: memref<128x256xbf16, #tpu.memory_space<vmem>>) attributes {dimension_semantics = [#tpu.dimension_semantics<parallel>], iteration_bounds = array<i64: 2>, scalar_prefetch = 0 : i64, scratch_operands = 1 : i64, tpu.core_type = #tpu.core_type<tc>, window_params = [{transform_indices = @transform_0, window_bounds = array<i64: 128, 128>}, {transform_indices = @transform_1, window_bounds = array<i64: 128, 128>}, {transform_indices = @transform_2, window_bounds = array<i64: 128, 128>}, {pipeline_mode = #tpu.pipeline_mode<synchronous>, transform_indices = @transform_3, window_bounds = array<i64: 256, 128>}, {pipeline_mode = #tpu.pipeline_mode<synchronous>, transform_indices = @transform_4, window_bounds = array<i64: 1, 128>}, {pipeline_mode = #tpu.pipeline_mode<synchronous>, transform_indices = @transform_5, window_bounds = array<i64: 128, 128>}, {pipeline_mode = #tpu.pipeline_mode<synchronous>, transform_indices = @transform_6, window_bounds = array<i64: 1, 128>}, {pipeline_mode = #tpu.pipeline_mode<synchronous>, transform_indices = @transform_7, window_bounds = array<i64: 128, 128>}, {pipeline_mode = #tpu.pipeline_mode<synchronous>, transform_indices = @transform_8, window_bounds = array<i64: 1, 128>}, {pipeline_mode = #tpu.pipeline_mode<synchronous>, transform_indices = @transform_9, window_bounds = array<i64: 128, 128>}, {pipeline_mode = #tpu.pipeline_mode<synchronous>, transform_indices = @transform_10, window_bounds = array<i64: 1, 128>}, {pipeline_mode = #tpu.pipeline_mode<synchronous>, transform_indices = @transform_11, window_bounds = array<i64: 128, 128>}, {pipeline_mode = #tpu.pipeline_mode<synchronous>, transform_indices = @transform_12, window_bounds = array<i64: 1, 128>}, {pipeline_mode = #tpu.pipeline_mode<synchronous>, transform_indices = @transform_13, window_bounds = array<i64: 128, 128>}, {pipeline_mode = #tpu.pipeline_mode<synchronous>, transform_indices = @transform_14, window_bounds = array<i64: 1, 128>}, {transform_indices = @transform_15, window_bounds = array<i64: 128, 128>}]} {
    %c0 = arith.constant 0 : index
    %c0_0 = arith.constant 0 : index
    %0 = vector.load %arg3[%c0, %c0_0] : memref<128x128xbf16, #tpu.memory_space<vmem>>, vector<128x128xbf16>
    %c0_1 = arith.constant 0 : index
    %c0_2 = arith.constant 0 : index
    %1 = vector.load %arg1[%c0_1, %c0_2] : memref<128x128xbf16, #tpu.memory_space<vmem>>, vector<128x128xbf16>
    %cst = arith.constant dense<0.000000e+00> : vector<128x128xf32>
    %2 = tpu.matmul %1, %0, %cst {dimension_numbers = #tpu.dot_dimension_numbers<[1], [0], [0], [1], [0, 0, 1, 1], [], []>} : vector<128x128xbf16>, vector<128x128xbf16>, vector<128x128xf32> -> vector<128x128xf32>
    %3 = arith.truncf %2 : vector<128x128xf32> to vector<128x128xbf16>
    %c0_3 = arith.constant 0 : index
    %c0_4 = arith.constant 0 : index
    %4 = vector.load %arg17[%c0_3, %c0_4] : memref<128x256xbf16, #tpu.memory_space<vmem>>, vector<128x128xbf16>
    tpu.vector_store %arg17[%c0_3, %c0_4], %3 {strides = array<i32>} : memref<128x256xbf16, #tpu.memory_space<vmem>>, vector<128x128xbf16>,
    %c0_5 = arith.constant 0 : index
    %c128 = arith.constant 128 : index
    %5 = vector.load %arg17[%c0_5, %c128] : memref<128x256xbf16, #tpu.memory_space<vmem>>, vector<128x128xbf16>
    tpu.vector_store %arg17[%c0_5, %c128], %0 {strides = array<i32>} : memref<128x256xbf16, #tpu.memory_space<vmem>>, vector<128x128xbf16>,
    %c0_6 = arith.constant 0 : index
    %c0_7 = arith.constant 0 : index
    %6 = vector.load %arg17[%c0_6, %c0_7] : memref<128x256xbf16, #tpu.memory_space<vmem>>, vector<128x256xbf16>
    %c0_8 = arith.constant 0 : index
    %c0_9 = arith.constant 0 : index
    %7 = vector.load %arg4[%c0_8, %c0_9] : memref<256x128xbf16, #tpu.memory_space<vmem>>, vector<256x128xbf16>
    %cst_10 = arith.constant dense<0.000000e+00> : vector<128x128xf32>
    %8 = tpu.matmul %6, %7, %cst_10 {dimension_numbers = #tpu.dot_dimension_numbers<[1], [0], [0], [1], [0, 0, 1, 1], [], []>} : vector<128x256xbf16>, vector<256x128xbf16>, vector<128x128xf32> -> vector<128x128xf32>
    %c0_11 = arith.constant 0 : index
    %c0_12 = arith.constant 0 : index
    %9 = vector.load %arg5[%c0_11, %c0_12] : memref<1x128xf32, #tpu.memory_space<vmem>>, vector<1x128xf32>
    %10 = vector.broadcast %9 : vector<1x128xf32> to vector<128x128xf32>
    %11 = arith.addf %8, %10 : vector<128x128xf32>
    %cst_13 = arith.constant 0.000000e+00 : f32
    %12 = vector.broadcast %cst_13 : f32 to vector<128x128xf32>
    %13 = arith.maximumf %11, %12 : vector<128x128xf32>
    %14 = arith.truncf %13 : vector<128x128xf32> to vector<128x128xbf16>
    %c0_14 = arith.constant 0 : index
    %c0_15 = arith.constant 0 : index
    %15 = vector.load %arg2[%c0_14, %c0_15] : memref<128x128xbf16, #tpu.memory_space<vmem>>, vector<128x128xbf16>
    %c0_16 = arith.constant 0 : index
    %c0_17 = arith.constant 0 : index
    %16 = vector.load %arg6[%c0_16, %c0_17] : memref<128x128xbf16, #tpu.memory_space<vmem>>, vector<128x128xbf16>
    %cst_18 = arith.constant dense<0.000000e+00> : vector<128x128xf32>
    %17 = tpu.matmul %14, %16, %cst_18 {dimension_numbers = #tpu.dot_dimension_numbers<[1], [0], [0], [1], [0, 0, 1, 1], [], []>} : vector<128x128xbf16>, vector<128x128xbf16>, vector<128x128xf32> -> vector<128x128xf32>
    %18 = arith.truncf %17 : vector<128x128xf32> to vector<128x128xbf16>
    %cst_19 = arith.constant dense<0.000000e+00> : vector<128x128xf32>
    %19 = tpu.matmul %15, %18, %cst_19 {dimension_numbers = #tpu.dot_dimension_numbers<[1], [0], [0], [1], [0, 0, 1, 1], [], []>} : vector<128x128xbf16>, vector<128x128xbf16>, vector<128x128xf32> -> vector<128x128xf32>
    %c0_20 = arith.constant 0 : index
    %c0_21 = arith.constant 0 : index
    %20 = vector.load %arg7[%c0_20, %c0_21] : memref<1x128xf32, #tpu.memory_space<vmem>>, vector<1x128xf32>
    %21 = vector.broadcast %20 : vector<1x128xf32> to vector<128x128xf32>
    %22 = arith.addf %19, %21 : vector<128x128xf32>
    %cst_22 = arith.constant 0.000000e+00 : f32
    %23 = vector.broadcast %cst_22 : f32 to vector<128x128xf32>
    %24 = arith.maximumf %22, %23 : vector<128x128xf32>
    %25 = arith.truncf %24 : vector<128x128xf32> to vector<128x128xbf16>
    %c0_23 = arith.constant 0 : index
    %c0_24 = arith.constant 0 : index
    %26 = vector.load %arg8[%c0_23, %c0_24] : memref<128x128xbf16, #tpu.memory_space<vmem>>, vector<128x128xbf16>
    %cst_25 = arith.constant dense<0.000000e+00> : vector<128x128xf32>
    %27 = tpu.matmul %25, %26, %cst_25 {dimension_numbers = #tpu.dot_dimension_numbers<[1], [0], [0], [1], [0, 0, 1, 1], [], []>} : vector<128x128xbf16>, vector<128x128xbf16>, vector<128x128xf32> -> vector<128x128xf32>
    %28 = arith.truncf %27 : vector<128x128xf32> to vector<128x128xbf16>
    %cst_26 = arith.constant dense<0.000000e+00> : vector<128x128xf32>
    %29 = tpu.matmul %15, %28, %cst_26 {dimension_numbers = #tpu.dot_dimension_numbers<[1], [0], [0], [1], [0, 0, 1, 1], [], []>} : vector<128x128xbf16>, vector<128x128xbf16>, vector<128x128xf32> -> vector<128x128xf32>
    %c0_27 = arith.constant 0 : index
    %c0_28 = arith.constant 0 : index
    %30 = vector.load %arg9[%c0_27, %c0_28] : memref<1x128xf32, #tpu.memory_space<vmem>>, vector<1x128xf32>
    %31 = vector.broadcast %30 : vector<1x128xf32> to vector<128x128xf32>
    %32 = arith.addf %29, %31 : vector<128x128xf32>
    %cst_29 = arith.constant 0.000000e+00 : f32
    %33 = vector.broadcast %cst_29 : f32 to vector<128x128xf32>
    %34 = arith.maximumf %32, %33 : vector<128x128xf32>
    %35 = arith.truncf %34 : vector<128x128xf32> to vector<128x128xbf16>
    %c0_30 = arith.constant 0 : index
    %c0_31 = arith.constant 0 : index
    %36 = vector.load %arg10[%c0_30, %c0_31] : memref<128x128xbf16, #tpu.memory_space<vmem>>, vector<128x128xbf16>
    %cst_32 = arith.constant dense<0.000000e+00> : vector<128x128xf32>
    %37 = tpu.matmul %35, %36, %cst_32 {dimension_numbers = #tpu.dot_dimension_numbers<[1], [0], [0], [1], [0, 0, 1, 1], [], []>} : vector<128x128xbf16>, vector<128x128xbf16>, vector<128x128xf32> -> vector<128x128xf32>
    %c0_33 = arith.constant 0 : index
    %c0_34 = arith.constant 0 : index
    %38 = vector.load %arg11[%c0_33, %c0_34] : memref<1x128xf32, #tpu.memory_space<vmem>>, vector<1x128xf32>
    %39 = vector.broadcast %38 : vector<1x128xf32> to vector<128x128xf32>
    %40 = arith.addf %37, %39 : vector<128x128xf32>
    %cst_35 = arith.constant 0.000000e+00 : f32
    %41 = vector.broadcast %cst_35 : f32 to vector<128x128xf32>
    %42 = arith.maximumf %40, %41 : vector<128x128xf32>
    %43 = arith.truncf %42 : vector<128x128xf32> to vector<128x128xbf16>
    %c0_36 = arith.constant 0 : index
    %c0_37 = arith.constant 0 : index
    %44 = vector.load %arg12[%c0_36, %c0_37] : memref<128x128xbf16, #tpu.memory_space<vmem>>, vector<128x128xbf16>
    %cst_38 = arith.constant dense<0.000000e+00> : vector<128x128xf32>
    %45 = tpu.matmul %43, %44, %cst_38 {dimension_numbers = #tpu.dot_dimension_numbers<[1], [0], [0], [1], [0, 0, 1, 1], [], []>} : vector<128x128xbf16>, vector<128x128xbf16>, vector<128x128xf32> -> vector<128x128xf32>
    %c0_39 = arith.constant 0 : index
    %c0_40 = arith.constant 0 : index
    %46 = vector.load %arg13[%c0_39, %c0_40] : memref<1x128xf32, #tpu.memory_space<vmem>>, vector<1x128xf32>
    %47 = vector.broadcast %46 : vector<1x128xf32> to vector<128x128xf32>
    %48 = arith.addf %45, %47 : vector<128x128xf32>
    %cst_41 = arith.constant 0.000000e+00 : f32
    %49 = vector.broadcast %cst_41 : f32 to vector<128x128xf32>
    %50 = arith.maximumf %48, %49 : vector<128x128xf32>
    %51 = arith.truncf %50 : vector<128x128xf32> to vector<128x128xbf16>
    %c0_42 = arith.constant 0 : index
    %c0_43 = arith.constant 0 : index
    %52 = vector.load %arg14[%c0_42, %c0_43] : memref<128x128xbf16, #tpu.memory_space<vmem>>, vector<128x128xbf16>
    %cst_44 = arith.constant dense<0.000000e+00> : vector<128x128xf32>
    %53 = tpu.matmul %51, %52, %cst_44 {dimension_numbers = #tpu.dot_dimension_numbers<[1], [0], [0], [1], [0, 0, 1, 1], [], []>} : vector<128x128xbf16>, vector<128x128xbf16>, vector<128x128xf32> -> vector<128x128xf32>
    %c0_45 = arith.constant 0 : index
    %c0_46 = arith.constant 0 : index
    %54 = vector.load %arg15[%c0_45, %c0_46] : memref<1x128xf32, #tpu.memory_space<vmem>>, vector<1x128xf32>
    %55 = vector.broadcast %54 : vector<1x128xf32> to vector<128x128xf32>
    %56 = arith.addf %53, %55 : vector<128x128xf32>
    %c0_47 = arith.constant 0 : index
    %c0_48 = arith.constant 0 : index
    %57 = vector.load %arg16[%c0_47, %c0_48] : memref<128x128xf32, #tpu.memory_space<vmem>>, vector<128x128xf32>
    tpu.vector_store %arg16[%c0_47, %c0_48], %56 {strides = array<i32>} : memref<128x128xf32, #tpu.memory_space<vmem>>, vector<128x128xf32>,
    return
  }
  func.func @transform_0(%arg0: i32) -> (i32, i32) {
    %c0_i32 = arith.constant 0 : i32
    %c0_i32_0 = arith.constant 0 : i32
    return %arg0, %c0_i32 : i32, i32
  }
  func.func @transform_1(%arg0: i32) -> (i32, i32) {
    %c0_i32 = arith.constant 0 : i32
    %c0_i32_0 = arith.constant 0 : i32
    return %arg0, %c0_i32 : i32, i32
  }
  func.func @transform_2(%arg0: i32) -> (i32, i32) {
    %c0_i32 = arith.constant 0 : i32
    %c0_i32_0 = arith.constant 0 : i32
    return %arg0, %c0_i32 : i32, i32
  }
  func.func @transform_3(%arg0: i32) -> (i32, i32) {
    %c0_i32 = arith.constant 0 : i32
    %c0_i32_0 = arith.constant 0 : i32
    %c0_i32_1 = arith.constant 0 : i32
    return %c0_i32, %c0_i32_0 : i32, i32
  }
  func.func @transform_4(%arg0: i32) -> (i32, i32) {
    %c0_i32 = arith.constant 0 : i32
    %c0_i32_0 = arith.constant 0 : i32
    %c0_i32_1 = arith.constant 0 : i32
    return %c0_i32, %c0_i32_0 : i32, i32
  }
  func.func @transform_5(%arg0: i32) -> (i32, i32) {
    %c0_i32 = arith.constant 0 : i32
    %c0_i32_0 = arith.constant 0 : i32
    %c0_i32_1 = arith.constant 0 : i32
    return %c0_i32, %c0_i32_0 : i32, i32
  }
  func.func @transform_6(%arg0: i32) -> (i32, i32) {
    %c0_i32 = arith.constant 0 : i32
    %c0_i32_0 = arith.constant 0 : i32
    %c0_i32_1 = arith.constant 0 : i32
    return %c0_i32, %c0_i32_0 : i32, i32
  }
  func.func @transform_7(%arg0: i32) -> (i32, i32) {
    %c0_i32 = arith.constant 0 : i32
    %c0_i32_0 = arith.constant 0 : i32
    %c0_i32_1 = arith.constant 0 : i32
    return %c0_i32, %c0_i32_0 : i32, i32
  }
  func.func @transform_8(%arg0: i32) -> (i32, i32) {
    %c0_i32 = arith.constant 0 : i32
    %c0_i32_0 = arith.constant 0 : i32
    %c0_i32_1 = arith.constant 0 : i32
    return %c0_i32, %c0_i32_0 : i32, i32
  }
  func.func @transform_9(%arg0: i32) -> (i32, i32) {
    %c0_i32 = arith.constant 0 : i32
    %c0_i32_0 = arith.constant 0 : i32
    %c0_i32_1 = arith.constant 0 : i32
    return %c0_i32, %c0_i32_0 : i32, i32
  }
  func.func @transform_10(%arg0: i32) -> (i32, i32) {
    %c0_i32 = arith.constant 0 : i32
    %c0_i32_0 = arith.constant 0 : i32
    %c0_i32_1 = arith.constant 0 : i32
    return %c0_i32, %c0_i32_0 : i32, i32
  }
  func.func @transform_11(%arg0: i32) -> (i32, i32) {
    %c0_i32 = arith.constant 0 : i32
    %c0_i32_0 = arith.constant 0 : i32
    %c0_i32_1 = arith.constant 0 : i32
    return %c0_i32, %c0_i32_0 : i32, i32
  }
  func.func @transform_12(%arg0: i32) -> (i32, i32) {
    %c0_i32 = arith.constant 0 : i32
    %c0_i32_0 = arith.constant 0 : i32
    %c0_i32_1 = arith.constant 0 : i32
    return %c0_i32, %c0_i32_0 : i32, i32
  }
  func.func @transform_13(%arg0: i32) -> (i32, i32) {
    %c0_i32 = arith.constant 0 : i32
    %c0_i32_0 = arith.constant 0 : i32
    %c0_i32_1 = arith.constant 0 : i32
    return %c0_i32, %c0_i32_0 : i32, i32
  }
  func.func @transform_14(%arg0: i32) -> (i32, i32) {
    %c0_i32 = arith.constant 0 : i32
    %c0_i32_0 = arith.constant 0 : i32
    %c0_i32_1 = arith.constant 0 : i32
    return %c0_i32, %c0_i32_0 : i32, i32
  }
  func.func @transform_15(%arg0: i32) -> (i32, i32) {
    %c0_i32 = arith.constant 0 : i32
    %c0_i32_0 = arith.constant 0 : i32
    return %arg0, %c0_i32 : i32, i32
  }
}

</mosaic_0001>

<bundles_post_ra>
// kernel: sequence_prediction_forward.1
= control target key start
LH: loop header
LB: loop body
LE: loop exit
PB: predicated region body
PF: predicated region fallthrough
CT: control target
= control target key end

     0   :  { %s3619_s0 = inlined_call_operand.vmem [shape: bf16[256,128], index: 0, kind: input, shape index: {}]   ;;  %s3620_s1 = inlined_call_operand.vmem [shape: bf16[256,128], index: 1, kind: input, shape index: {}]   ;;  %s3621_s2 = inlined_call_operand.vmem [shape: bf16[256,128], index: 2, kind: input, shape index: {}]   ;;  %s3622_s3 = inlined_call_operand.vmem [shape: bf16[256,128], index: 3, kind: input, shape index: {}]   ;;  %s3623_s4 = inlined_call_operand.vmem [shape: f32[1,128], index: 4, kind: input, shape index: {}]   ;;  %s3624_s5 = inlined_call_operand.vmem [shape: bf16[128,128], index: 5, kind: input, shape index: {}]   ;;  %s3625_s6 = inlined_call_operand.hbm [shape: f32[1,128], index: 6, kind: input, shape index: {}]   ;;  %s3626_s7 = inlined_call_operand.vmem [shape: bf16[128,128], index: 7, kind: input, shape index: {}]   ;;  %s3627_s8 = inlined_call_operand.hbm [shape: f32[1,128], index: 8, kind: input, shape index: {}]   ;;  %s3628_s9 = inlined_call_operand.hbm [shape: bf16[128,128], index: 9, kind: input, shape index: {}]   ;;  %s3629_s10 = inlined_call_operand.hbm [shape: f32[1,128], index: 10, kind: input, shape index: {}]   ;;  %s3630_s11 = inlined_call_operand.hbm [shape: bf16[128,128], index: 11, kind: input, shape index: {}]   ;;  %s3631_s12 = inlined_call_operand.hbm [shape: f32[1,128], index: 12, kind: input, shape index: {}]   ;;  %s3632_s13 = inlined_call_operand.hbm [shape: bf16[128,128], index: 13, kind: input, shape index: {}]   ;;  %s3633_s14 = inlined_call_operand.hbm [shape: f32[1,128], index: 14, kind: input, shape index: {}]   ;;  %s3634_s15 = inlined_call_operand.vmem [shape: f32[256,128], index: 15, kind: output, shape index: {}]  }
   0x1   :  { %3636 = sst [smem:[#allocation21_spill]] %s3627_s8 }
   0x2   :  { %3637 = sst [smem:[#allocation22_spill]] %s3629_s10 }
   0x3   :  { %3638 = sst [smem:[#allocation23_spill]] %s3631_s12 }
   0x4   :  { %3639 = sst [smem:[#allocation24_spill]] %s3634_s15 }
   0x5   :  { %20 = vsyncpa [#allocation4], 0 }
   0x6   :  { %21 = vsyncpa [#allocation6], 0 }
   0x7   :  { %22 = vsyncpa [#allocation9], 0 }
   0x8   :  { %23 = vsyncpa [#allocation12], 0 }
   0x9   :  { %24 = vsyncpa [#allocation15], 0  ;;  %s3256_s18 = smov 0  }
   0xa LB: > { %s3640_s8 = sld [smem:[#allocation21_spill]]  ;;  %s3635_s22 = sadd.s32 4294967295, %s3164_s18   ;;  %s3164_s18 = sphi %s3256_s18, %s30_s18  }
   0xb   : > { %p2276_p0 = scmp.ge.s32.totalorder %s3164_s18, 1  ;;  %p391_p1 = scmp.lt.s32.totalorder %s3164_s18, 3 }
   0xc   : > { %p3269_p2 = scmp.eq.s32.totalorder %s3635_s22, 0  ;;  %s3166_s25 = smov [#allocation5]  }
   0xd   : > { %p3273_p3 = pnand %p2276_p0, %p391_p1  ;;  %s429_s26 = sshll.u32 %s3166_s25, 4  ;;  %s430_s26 = int_to_ptr.vmem [resolvable:$true] %s429_s26 }
   0xe   : > { %s3643_s10 = sld [smem:[#allocation22_spill]]  ;;  %s3167_s20 = smov [#allocation8]  }
   0xf   : > { %p2833_p4 = pneg %p3273_p3  ;;  %s3644_s12 = sld [smem:[#allocation23_spill]] }
  0x10   : > { %s427_s21 = sshll.u32 %s3640_s8, 4  ;;  %s455_s25 = sshll.u32 %s3167_s20, 4  ;;  %s428_s21 = int_to_ptr.hbm [resolvable:$true] %s427_s21  ;;  %s456_s25 = int_to_ptr.vmem [resolvable:$true] %s455_s25 }
  0x11   : > { %p3287_p5 = pnand %p3269_p2, %p2833_p4  ;;  %s3168_s27 = smov [#allocation11]  }
  0x12   : > { %s481_s28 = sshll.u32 %s3168_s27, 4  ;;  %s412_s22 = sshll.u32 %s3625_s6, 4  ;;  %s482_s28 = int_to_ptr.vmem [resolvable:$true] %s481_s28  ;;  %s413_s22 = int_to_ptr.hbm [resolvable:$true] %s412_s22 }
  0x13   : > { %2839 = dma.hbm_to_vmem [thread:$0]  (!%p3287_p5), %s428_s21, 16, %s430_s26, [#allocation6]  }
  0x14   : > { %s453_s29 = sshll.u32 %s3643_s10, 4  ;;  %s438_s10 = sshll.u32 %s3628_s9, 4  ;;  %s454_s29 = int_to_ptr.hbm [resolvable:$true] %s453_s29  ;;  %s439_s10 = int_to_ptr.hbm [resolvable:$true] %s438_s10 }
  0x15   : > { %s479_s17 = sshll.u32 %s3644_s12, 4  ;;  %s3169_s12 = smov [#allocation3]   ;;  %s480_s17 = int_to_ptr.hbm [resolvable:$true] %s479_s17 }
  0x16   : > { %2845 = dma.hbm_to_vmem [thread:$0]  (!%p3287_p5), %s454_s29, 16, %s456_s25, [#allocation9]  }
  0x17   : > { %2851 = dma.hbm_to_vmem [thread:$0]  (!%p3287_p5), %s480_s17, 16, %s482_s28, [#allocation12]  }
  0x18   : > { %s414_s15 = sshll.u32 %s3169_s12, 4  ;;  %s3170_s21 = smov [#allocation7]   ;;  %s415_s15 = int_to_ptr.vmem [resolvable:$true] %s414_s15 }
  0x19   : > { %2836 = dma.hbm_to_vmem [thread:$0]  (!%p3287_p5), %s413_s22, 16, %s415_s15, [#allocation4]  }
  0x1a   : > { %s440_s26 = sshll.u32 %s3170_s21, 4  ;;  %s3171_s29 = smov 64   ;;  %s441_s26 = int_to_ptr.vmem [resolvable:$true] %s440_s26 }
  0x1b   : > { %s3172_s25 = smov 4   ;;  %s464_s8 = sshll.u32 %s3630_s11, 4  ;;  %s465_s8 = int_to_ptr.hbm [resolvable:$true] %s464_s8 }
  0x1c   : > { %2842 = dma.hbm_to_vmem [thread:$0]  (!%p3287_p5), %s439_s10, 1024, %s441_s26, [#allocation6], %s3171_s29, %s3171_s29, %s3172_s25  }
  0x1d   : > { %s3173_s12 = smov [#allocation10]   ;;  %s490_s15 = sshll.u32 %s3632_s13, 4  ;;  %s491_s15 = int_to_ptr.hbm [resolvable:$true] %s490_s15 }
  0x1e   : > { %s466_s28 = sshll.u32 %s3173_s12, 4  ;;  %s3174_s22 = smov [#allocation13]   ;;  %s467_s28 = int_to_ptr.vmem [resolvable:$true] %s466_s28 }
  0x1f   : > { %2848 = dma.hbm_to_vmem [thread:$0]  (!%p3287_p5), %s465_s8, 1024, %s467_s28, [#allocation9], %s3171_s29, %s3171_s29, %s3172_s25  }
  0x20   : > { %s492_s20 = sshll.u32 %s3174_s22, 4  ;;  %s505_s26 = sshll.u32 %s3633_s14, 4  ;;  %s493_s20 = int_to_ptr.vmem [resolvable:$true] %s492_s20  ;;  %s506_s26 = int_to_ptr.hbm [resolvable:$true] %s505_s26 }
  0x21   : > { %2854 = dma.hbm_to_vmem [thread:$0]  (!%p3287_p5), %s491_s15, 1024, %s493_s20, [#allocation12], %s3171_s29, %s3171_s29, %s3172_s25  }
  0x22   : > { %s3175_s17 = smov [#allocation14]   ;;  %547 = sbr.rel (%p3273_p3) target bundleno = 1760 (0x6e0), region = 80 }
  0x23   : > { %s507_s27 = sshll.u32 %s3175_s17, 4  ;;  %s508_s27 = int_to_ptr.vmem [resolvable:$true] %s507_s27 }
  0x24   : > { %2857 = dma.hbm_to_vmem [thread:$0]  (!%p3287_p5), %s506_s26, 16, %s508_s27, [#allocation15]  }
  0x27   : > { %3143 = dma.done.wait (%p3269_p2), [#allocation4], 16  }
  0x28   : > { %3145 = vsyncadd (%p3269_p2), [#allocation4], 4294967280 }
  0x29   : > { %3147 = dma.done.wait (%p3269_p2), [#allocation6], 1040  }
  0x2a   : > { %3149 = vsyncadd (%p3269_p2), [#allocation6], 4294966256 }
  0x2b   : > { %3151 = dma.done.wait (%p3269_p2), [#allocation9], 1040  }
  0x2c   : > { %3153 = vsyncadd (%p3269_p2), [#allocation9], 4294966256 }
  0x2d   : > { %3155 = dma.done.wait (%p3269_p2), [#allocation12], 1040  }
  0x2e   : > { %3157 = vsyncadd (%p3269_p2), [#allocation12], 4294966256 }
  0x2f   : > { %3159 = dma.done.wait (%p3269_p2), [#allocation15], 16  }
  0x30   : > { %3161 = vsyncadd (%p3269_p2), [#allocation15], 4294967280  ;;  %s3646_s24 = sadd.s32 4294967295, %s3164_s18   ;;  %v2736_v12 = vld [vmem:[%s3622_s3 + $0x78] sm:$0xff]  ;;  %v2735_v14 = vld [vmem:[%s3622_s3 + $0x70] sm:$0xff]  ;;  %s3647_s27 = sld [smem:[#allocation24_spill]] }
  0x31   : > { %s2295_s19 = sshll.u32 %s3646_s24, 4  ;;  %v2728_v13 = vld [vmem:[%s3622_s3 + $0x38] sm:$0xff]  ;;  %v2727_v15 = vld [vmem:[%s3622_s3 + $0x30] sm:$0xff]  ;;  %v2734_v16 = vld [vmem:[%s3622_s3 + $0x68] sm:$0xff] }
  0x32   : > { %p642_p6 = scmp.lt.s32.totalorder %s2295_s19, 31  ;;  %1118 = vmatpush.bf16.msra.mxu1 %v2728_v13  ;;  %2793 = vmatpush.bf16.msra.mxu3 %v2728_v13  ;;  %v2726_v17 = vld [vmem:[%s3622_s3 + $0x28] sm:$0xff]  ;;  %v2733_v19 = vld [vmem:[%s3622_s3 + $0x60] sm:$0xff]  ;;  %v2732_v21 = vld [vmem:[%s3622_s3 + $0x58] sm:$0xff] }
  0x33   : > { %v2731_v22 = vld [vmem:[%s3622_s3 + $0x50] sm:$0xff]  ;;  %v2730_v23 = vld [vmem:[%s3622_s3 + $0x48] sm:$0xff]  ;;  %v2729_v25 = vld [vmem:[%s3622_s3 + $0x40] sm:$0xff] }
  0x34   : > { %s3649_s19 = smov (!%p642_p6, %s2295_s19), 31  ;;  %v2725_v32 = vld [vmem:[%s3622_s3 + $0x20] sm:$0xff]  ;;  %v2724_v33 = vld [vmem:[%s3622_s3 + $0x18] sm:$0xff]  ;;  %v2723_v36 = vld [vmem:[%s3622_s3 + $0x10] sm:$0xff] }
  0x35   : > { %s3349_s29 = sshll.u32 %s3649_s19, 2  ;;  %v2722_v37 = vld [vmem:[%s3622_s3 + $0x8] sm:$0xff]  ;;  %v2721_v41 = vld [vmem:[%s3622_s3] sm:$0xff] }
  0x36   : > { %s3355_s12 = scalar_lea.vmem %s3621_s2, %s3349_s29  ;;  %s3369_s30 = scalar_lea.vmem %s3619_s0, %s3349_s29  ;;  %1119 = vmatpush.bf16.msra.mxu1 %v2727_v15  ;;  %2794 = vmatpush.bf16.msra.mxu3 %v2727_v15 }
  0x37   : > { %v2696_v0 = vld [vmem:[%s3355_s12 + $0x38] sm:$0xff]  ;;  %v2695_v1 = vld [vmem:[%s3355_s12 + $0x30] sm:$0xff]  ;;  %v2694_v2 = vld [vmem:[%s3355_s12 + $0x28] sm:$0xff]  ;;  %s3492_s26 = scalar_lea.vmem %s3620_s1, %s3349_s29 }
  0x38   : > { %793 = vmatpush.bf16.msra.mxu0 %v2696_v0  ;;  %2785 = vmatpush.bf16.msra.mxu2 %v2696_v0  ;;  %v2693_v3 = vld [vmem:[%s3355_s12 + $0x20] sm:$0xff]  ;;  %v2692_v4 = vld [vmem:[%s3355_s12 + $0x18] sm:$0xff]  ;;  %v2691_v5 = vld [vmem:[%s3355_s12 + $0x10] sm:$0xff] }
  0x39   : > { %v2690_v6 = vld [vmem:[%s3355_s12 + $0x8] sm:$0xff]  ;;  %v2689_v7 = vld [vmem:[%s3355_s12] sm:$0xff]  ;;  %v2699_v18 = vld [vmem:[%s3369_s30 + $0x10] sm:$0xff] }
  0x3a   : > { %v2697_v8 = vld [vmem:[%s3369_s30] sm:$0xff]  ;;  %v2698_v10 = vld [vmem:[%s3369_s30 + $0x8] sm:$0xff]  ;;  %1120 = vmatpush.bf16.msra.mxu1 %v2726_v17  ;;  %2795 = vmatpush.bf16.msra.mxu3 %v2726_v17  ;;  %v2703_v20 = vld [vmem:[%s3369_s30 + $0x30] sm:$0xff] }
  0x3b   : > { %v2701_v9 = vld [vmem:[%s3369_s30 + $0x20] sm:$0xff]  ;;  %v2702_v11 = vld [vmem:[%s3369_s30 + $0x28] sm:$0xff]  ;;  %v2700_v24 = vld [vmem:[%s3369_s30 + $0x18] sm:$0xff] }
  0x3c   : > { %794 = vmatpush.bf16.msra.mxu0 %v2695_v1  ;;  %2786 = vmatpush.bf16.msra.mxu2 %v2695_v1  ;;  %v2704_v26 = vld [vmem:[%s3369_s30 + $0x38] sm:$0xff]  ;;  %v665_v27 = vld [vmem:[%s3355_s12] sm:$0xf]  ;;  %v666_v28 = vld [vmem:[%s3355_s12 + $0x4] sm:$0xf] }
  0x3d   : > { %874 = vst [vmem:[#allocation2 + $0x4] sm:$0xf] %v665_v27  ;;  %v667_v34 = vld [vmem:[%s3355_s12 + $0x8] sm:$0xf]  ;;  %v668_v35 = vld [vmem:[%s3355_s12 + $0xc] sm:$0xf] }
  0x3e   : > { %875 = vst [vmem:[#allocation2 + $0xc] sm:$0xf] %v666_v28  ;;  %1121 = vmatpush.bf16.msra.mxu1 %v2725_v32  ;;  %2796 = vmatpush.bf16.msra.mxu3 %v2725_v32  ;;  %v669_v42 = vld [vmem:[%s3355_s12 + $0x10] sm:$0xf]  ;;  %v670_v43 = vld [vmem:[%s3355_s12 + $0x14] sm:$0xf] }
  0x3f   : > { %876 = vst [vmem:[#allocation2 + $0x14] sm:$0xf] %v667_v34  ;;  %v671_v49 = vld [vmem:[%s3355_s12 + $0x18] sm:$0xf]  ;;  %v672_v50 = vld [vmem:[%s3355_s12 + $0x1c] sm:$0xf] }
  0x40   : > { %795 = vmatpush.bf16.msra.mxu0 %v2694_v2  ;;  %2787 = vmatpush.bf16.msra.mxu2 %v2694_v2  ;;  %877 = vst [vmem:[#allocation2 + $0x1c] sm:$0xf] %v668_v35  ;;  %v673_v1 = vld [vmem:[%s3355_s12 + $0x20] sm:$0xf]  ;;  %v674_v2 = vld [vmem:[%s3355_s12 + $0x24] sm:$0xf] }
  0x41   : > { %878 = vst [vmem:[#allocation2 + $0x24] sm:$0xf] %v669_v42  ;;  %v679_v34 = vld [vmem:[%s3355_s12 + $0x38] sm:$0xf]  ;;  %v680_v35 = vld [vmem:[%s3355_s12 + $0x3c] sm:$0xf] }
  0x42   : > { %1122 = vmatpush.bf16.msra.mxu1 %v2724_v33  ;;  %2797 = vmatpush.bf16.msra.mxu3 %v2724_v33  ;;  %879 = vst [vmem:[#allocation2 + $0x2c] sm:$0xf] %v670_v43 }
  0x43   : > { %880 = vst [vmem:[#allocation2 + $0x34] sm:$0xf] %v671_v49 }
  0x44   : > { %796 = vmatpush.bf16.msra.mxu0 %v2693_v3  ;;  %2788 = vmatpush.bf16.msra.mxu2 %v2693_v3  ;;  %v2705_v29 = vld [vmem:[#allocation2 + $0x4] sm:$0xf]  ;;  %881 = vst [vmem:[#allocation2 + $0x3c] sm:$0xf] %v672_v50 }
  0x45   : > { %v2371_v30 = vld [vmem:[#allocation2 + $0x8] sm:$0xf0]  ;;  %882 = vst [vmem:[#allocation2 + $0x44] sm:$0xf] %v673_v1 }
  0x46   : > { %v2374_v31 = vor.u32 %v2705_v29, %v2371_v30  ;;  %1123 = vmatpush.bf16.msra.mxu1 %v2723_v36  ;;  %2798 = vmatpush.bf16.msra.mxu3 %v2723_v36  ;;  %v2707_v38 = vld [vmem:[#allocation2 + $0x14] sm:$0xf]  ;;  %883 = vst [vmem:[#allocation2 + $0x4c] sm:$0xf] %v674_v2  ;;  %v2750_v1 = vld [vmem:[%s3624_s5 + $0x28] sm:$0xff] }
  0x47   : > { %v2379_v39 = vld [vmem:[#allocation2 + $0x18] sm:$0xf0]  ;;  %888 = vst [vmem:[#allocation2 + $0x74] sm:$0xf] %v679_v34 }
  0x48   : > { %797 = vmatpush.bf16.msra.mxu0 %v2692_v4  ;;  %2789 = vmatpush.bf16.msra.mxu2 %v2692_v4  ;;  %v2382_v40 = vor.u32 %v2707_v38, %v2379_v39  ;;  %v2709_v44 = vld [vmem:[#allocation2 + $0x24] sm:$0xf]  ;;  %889 = vst [vmem:[#allocation2 + $0x7c] sm:$0xf] %v680_v35 }
  0x49   : > { %v2387_v45 = vld [vmem:[#allocation2 + $0x28] sm:$0xf0] }
  0x4a   : > { %1124 = vmatpush.bf16.msra.mxu1 %v2722_v37  ;;  %2799 = vmatpush.bf16.msra.mxu3 %v2722_v37  ;;  %v2390_v47 = vor.u32 %v2709_v44, %v2387_v45  ;;  %v2711_v55 = vld [vmem:[#allocation2 + $0x34] sm:$0xf] }
  0x4b   : > { %v2395_v56 = vld [vmem:[#allocation2 + $0x38] sm:$0xf0] }
  0x4c   : > { %798 = vmatpush.bf16.msra.mxu0 %v2691_v5  ;;  %2790 = vmatpush.bf16.msra.mxu2 %v2691_v5  ;;  %v2398_v58 = vor.u32 %v2711_v55, %v2395_v56 }
  0x4e   : > { %1125 = vmatpush.bf16.msra.mxu1 %v2721_v41  ;;  %2800 = vmatpush.bf16.msra.mxu3 %v2721_v41 }
  0x50   : > { %799 = vmatpush.bf16.msra.mxu0 %v2690_v6  ;;  %2791 = vmatpush.bf16.msra.mxu2 %v2690_v6 }
  0x54   : > { %800 = vmatpush.bf16.msra.mxu0 %v2689_v7  ;;  %2792 = vmatpush.bf16.msra.mxu2 %v2689_v7 }
  0x57   : > { %801 = vmatmul.bf16.vlgmr.msra.gmra.mxu0 %v2697_v8  ;;  %821 = vmatmul.bf16.vlgmr.msra.gmra.mxu2 %v2701_v9 }
  0x58   : > { %1167 = vmatpush.bf16.msrb.mxu2 %v2736_v12 }
  0x5c   : > { %1168 = vmatpush.bf16.msrb.mxu2 %v2735_v14 }
  0x60   : > { %1169 = vmatpush.bf16.msrb.mxu2 %v2734_v16 }
  0x64   : > { %1170 = vmatpush.bf16.msrb.mxu2 %v2733_v19 }
  0x67   : > { %806 = vmatmul.bf16.gmra.mxu0 %v2698_v10  ;;  %826 = vmatmul.bf16.gmra.mxu2 %v2702_v11  ;;  %v2713_v10 = vld [vmem:[#allocation2 + $0x44] sm:$0xf]  ;;  %v2403_v11 = vld [vmem:[#allocation2 + $0x48] sm:$0xf0] }
  0x68   : > { %1171 = vmatpush.bf16.msrb.mxu2 %v2732_v21  ;;  %v2406_v13 = vor.u32 %v2713_v10, %v2403_v11  ;;  %v676_v21 = vld [vmem:[%s3355_s12 + $0x2c] sm:$0xf] }
  0x69   : > { %885 = vst [vmem:[#allocation2 + $0x5c] sm:$0xf] %v676_v21 }
  0x6c   : > { %1172 = vmatpush.bf16.msrb.mxu2 %v2731_v22  ;;  %v677_v22 = vld [vmem:[%s3355_s12 + $0x30] sm:$0xf] }
  0x6d   : > { %886 = vst [vmem:[#allocation2 + $0x64] sm:$0xf] %v677_v22 }
  0x70   : > { %1173 = vmatpush.bf16.msrb.mxu2 %v2730_v23  ;;  %v678_v23 = vld [vmem:[%s3355_s12 + $0x34] sm:$0xf]  ;;  %v2411_v32 = vld [vmem:[#allocation2 + $0x58] sm:$0xf0] }
  0x71   : > { %887 = vst [vmem:[#allocation2 + $0x6c] sm:$0xf] %v678_v23 }
  0x74   : > { %1174 = vmatpush.bf16.msrb.mxu2 %v2729_v25 }
  0x77   : > { %811 = vmatmul.bf16.gmra.mxu0 %v2699_v18  ;;  %831 = vmatmul.bf16.gmra.mxu2 %v2703_v20  ;;  %v675_v20 = vld [vmem:[%s3355_s12 + $0x28] sm:$0xf] }
  0x78   : > { %884 = vst [vmem:[#allocation2 + $0x54] sm:$0xf] %v675_v20  ;;  %v2419_v49 = vld [vmem:[#allocation2 + $0x68] sm:$0xf0] }
  0x87   : > { %816 = vmatmul.bf16.gmra.mxu0 %v2700_v24  ;;  %836 = vmatmul.bf16.gmra.mxu2 %v2704_v26 }
  0x97   : > { %1175 = vmatmul.bf16.vlgmr.msrb.gmra.mxu2 %v2374_v31  ;;  %v2715_v31 = vld [vmem:[#allocation2 + $0x54] sm:$0xf] }
  0x98   : > { %v2414_v33 = vor.u32 %v2715_v31, %v2411_v32 }
  0xa7   : > { %1180 = vmatmul.bf16.gmra.mxu2 %v2382_v40 }
  0xb7   : > { %1185 = vmatmul.bf16.gmra.mxu2 %v2390_v47 }
  0xc7   : > { %1190 = vmatmul.bf16.gmra.mxu2 %v2398_v58  ;;  %v2752_v58 = vld [vmem:[%s3624_s5 + $0x38] sm:$0xff] }
  0xc8   : > { %1320 = vmatpush.bf16.msrb.mxu3 %v2752_v58 }
  0xd4   : > { %v802_v46 = vpop.f32.mrf.mxu0 }
  0xd5   : > { %v842_v48 = vpack.c.bf16 %v802_v46, %v802_v46 }
  0xd7   : > { %858 = vst [vmem:[#allocation2] sm:$0xf] %v842_v48  ;;  %1195 = vmatmul.bf16.gmra.mxu2 %v2406_v13  ;;  %v2717_v48 = vld [vmem:[#allocation2 + $0x64] sm:$0xf]  ;;  %v3470_v13 = vld [vmem:[%s3623_s4] ss:$0 sm:$0xff] }
  0xda   : > { %v822_v53 = vpop.f32.mrf.mxu2 }
  0xdb   : > { %v850_v54 = vpack.c.bf16 %v822_v53, %v822_v53 }
  0xdc   : > { %v804_v51 = vpop.f32.mrf.mxu0 }
  0xdd   : > { %v843_v52 = vpack.c.bf16 %v804_v51, %v804_v51  ;;  %866 = vst [vmem:[#allocation2 + $0x40] sm:$0xf] %v850_v54 }
  0xde   : > { %v2369_v60 = vld [vmem:[#allocation2] sm:$0xf] }
  0xdf   : > { %859 = vst [vmem:[#allocation2 + $0x8] sm:$0xf] %v843_v52  ;;  %v2422_v52 = vor.u32 %v2717_v48, %v2419_v49 }
  0xe2   : > { %v824_v62 = vpop.f32.mrf.mxu2 }
  0xe3   : > { %v851_v0 = vpack.c.bf16 %v824_v62, %v824_v62  ;;  %v2427_v62 = vld [vmem:[#allocation2 + $0x78] sm:$0xf0] }
  0xe4   : > { %v807_v57 = vpop.f32.mrf.mxu0  ;;  %v2401_v7 = vld [vmem:[#allocation2 + $0x40] sm:$0xf] }
  0xe5   : > { %v844_v59 = vpack.c.bf16 %v807_v57, %v807_v57  ;;  %867 = vst [vmem:[#allocation2 + $0x48] sm:$0xf] %v851_v0 }
  0xe6   : > { %v2706_v61 = vld [vmem:[#allocation2 + $0x4] sm:$0xf0] }
  0xe7   : > { %860 = vst [vmem:[#allocation2 + $0x10] sm:$0xf] %v844_v59  ;;  %v2370_v63 = vor.u32 %v2706_v61, %v2369_v60  ;;  %1200 = vmatmul.bf16.gmra.mxu2 %v2414_v33  ;;  %v2751_v59 = vld [vmem:[%s3624_s5 + $0x30] sm:$0xff] }
  0xe8   : > { %v2719_v61 = vld [vmem:[#allocation2 + $0x74] sm:$0xf]  ;;  %1321 = vmatpush.bf16.msrb.mxu3 %v2751_v59 }
  0xe9   : > { %1126 = vmatmul.bf16.vlgmr.msra.gmra.mxu1 %v2370_v63  ;;  %v2430_v2 = vor.u32 %v2719_v61, %v2427_v62 }
  0xea   : > { %v827_v5 = vpop.f32.mrf.mxu2 }
  0xeb   : > { %v852_v6 = vpack.c.bf16 %v827_v5, %v827_v5  ;;  %v2748_v5 = vld [vmem:[%s3624_s5 + $0x18] sm:$0xff] }
  0xec   : > { %v809_v3 = vpop.f32.mrf.mxu0  ;;  %v2714_v8 = vld [vmem:[#allocation2 + $0x44] sm:$0xf0]  ;;  %1322 = vmatpush.bf16.msrb.mxu3 %v2750_v1 }
  0xed   : > { %v845_v4 = vpack.c.bf16 %v809_v3, %v809_v3  ;;  %868 = vst [vmem:[#allocation2 + $0x50] sm:$0xf] %v852_v6  ;;  %v2402_v9 = vor.u32 %v2714_v8, %v2401_v7  ;;  %v2749_v3 = vld [vmem:[%s3624_s5 + $0x20] sm:$0xff]  ;;  %v2747_v6 = vld [vmem:[%s3624_s5 + $0x10] sm:$0xff]  ;;  %v2746_v8 = vld [vmem:[%s3624_s5 + $0x8] sm:$0xff] }
  0xee   : > { %v2377_v15 = vld [vmem:[#allocation2 + $0x10] sm:$0xf] }
  0xef   : > { %861 = vst [vmem:[#allocation2 + $0x18] sm:$0xf] %v845_v4  ;;  %1146 = vmatmul.bf16.vlgmr.msra.gmra.mxu3 %v2402_v9  ;;  %v2745_v9 = vld [vmem:[%s3624_s5] sm:$0xff] }
  0xf0   : > { %1323 = vmatpush.bf16.msrb.mxu3 %v2749_v3 }
  0xf2   : > { %v829_v17 = vpop.f32.mrf.mxu2 }
  0xf3   : > { %v853_v19 = vpack.c.bf16 %v829_v17, %v829_v17 }
  0xf4   : > { %v812_v12 = vpop.f32.mrf.mxu0  ;;  %v2409_v27 = vld [vmem:[#allocation2 + $0x50] sm:$0xf]  ;;  %1324 = vmatpush.bf16.msrb.mxu3 %v2748_v5 }
  0xf5   : > { %v846_v14 = vpack.c.bf16 %v812_v12, %v812_v12  ;;  %869 = vst [vmem:[#allocation2 + $0x58] sm:$0xf] %v853_v19 }
  0xf6   : > { %v2708_v16 = vld [vmem:[#allocation2 + $0x14] sm:$0xf0] }
  0xf7   : > { %862 = vst [vmem:[#allocation2 + $0x20] sm:$0xf] %v846_v14  ;;  %v2378_v18 = vor.u32 %v2708_v16, %v2377_v15  ;;  %1205 = vmatmul.bf16.gmra.mxu2 %v2422_v52 }
  0xf8   : > { %1325 = vmatpush.bf16.msrb.mxu3 %v2747_v6 }
  0xf9   : > { %1131 = vmatmul.bf16.gmra.mxu1 %v2378_v18 }
  0xfa   : > { %v832_v26 = vpop.f32.mrf.mxu2 }
  0xfb   : > { %v854_v28 = vpack.c.bf16 %v832_v26, %v832_v26 }
  0xfc   : > { %v814_v24 = vpop.f32.mrf.mxu0  ;;  %v2716_v29 = vld [vmem:[#allocation2 + $0x54] sm:$0xf0]  ;;  %1326 = vmatpush.bf16.msrb.mxu3 %v2746_v8 }
  0xfd   : > { %v847_v25 = vpack.c.bf16 %v814_v24, %v814_v24  ;;  %870 = vst [vmem:[#allocation2 + $0x60] sm:$0xf] %v854_v28  ;;  %v2410_v30 = vor.u32 %v2716_v29, %v2409_v27 }
  0xfe   : > { %v2385_v38 = vld [vmem:[#allocation2 + $0x20] sm:$0xf] }
  0xff   : > { %863 = vst [vmem:[#allocation2 + $0x28] sm:$0xf] %v847_v25  ;;  %1151 = vmatmul.bf16.gmra.mxu3 %v2410_v30 }
 0x100   : > { %1327 = vmatpush.bf16.msrb.mxu3 %v2745_v9 }
 0x102   : > { %v834_v40 = vpop.f32.mrf.mxu2 }
 0x103   : > { %v855_v42 = vpack.c.bf16 %v834_v40, %v834_v40 }
 0x104   : > { %v817_v36 = vpop.f32.mrf.mxu0  ;;  %v2417_v46 = vld [vmem:[#allocation2 + $0x60] sm:$0xf] }
 0x105   : > { %v848_v37 = vpack.c.bf16 %v817_v36, %v817_v36  ;;  %871 = vst [vmem:[#allocation2 + $0x68] sm:$0xf] %v855_v42 }
 0x106   : > { %v2710_v39 = vld [vmem:[#allocation2 + $0x24] sm:$0xf0] }
 0x107   : > { %864 = vst [vmem:[#allocation2 + $0x30] sm:$0xf] %v848_v37  ;;  %v2386_v41 = vor.u32 %v2710_v39, %v2385_v38  ;;  %1210 = vmatmul.bf16.gmra.mxu2 %v2430_v2 }
 0x109   : > { %1136 = vmatmul.bf16.gmra.mxu1 %v2386_v41 }
 0x10a   : > { %v837_v45 = vpop.f32.mrf.mxu2 }
 0x10b   : > { %v856_v47 = vpack.c.bf16 %v837_v45, %v837_v45 }
 0x10c   : > { %v819_v43 = vpop.f32.mrf.mxu0  ;;  %v2718_v50 = vld [vmem:[#allocation2 + $0x64] sm:$0xf0] }
 0x10d   : > { %v849_v44 = vpack.c.bf16 %v819_v43, %v819_v43  ;;  %872 = vst [vmem:[#allocation2 + $0x70] sm:$0xf] %v856_v47  ;;  %v2418_v51 = vor.u32 %v2718_v50, %v2417_v46 }
 0x10e   : > { %v2393_v53 = vld [vmem:[#allocation2 + $0x30] sm:$0xf] }
 0x10f   : > { %865 = vst [vmem:[#allocation2 + $0x38] sm:$0xf] %v849_v44  ;;  %1156 = vmatmul.bf16.gmra.mxu3 %v2418_v51 }
 0x112   : > { %v839_v55 = vpop.f32.mrf.mxu2 }
 0x113   : > { %v857_v57 = vpack.c.bf16 %v839_v55, %v839_v55 }
 0x114   : > { %v2425_v60 = vld [vmem:[#allocation2 + $0x70] sm:$0xf] }
 0x115   : > { %873 = vst [vmem:[#allocation2 + $0x78] sm:$0xf] %v857_v57 }
 0x116   : > { %v2712_v54 = vld [vmem:[#allocation2 + $0x34] sm:$0xf0] }
 0x117   : > { %v2394_v56 = vor.u32 %v2712_v54, %v2393_v53 }
 0x119   : > { %1141 = vmatmul.bf16.gmra.mxu1 %v2394_v56 }
 0x11a   : > { %v1176_v4 = vpop.f32.mrf.mxu2 }
 0x11c   : > { %v2720_v63 = vld [vmem:[#allocation2 + $0x74] sm:$0xf0] }
 0x11d   : > { %v2426_v0 = vor.u32 %v2720_v63, %v2425_v60 }
 0x11f   : > { %1161 = vmatmul.bf16.gmra.mxu3 %v2426_v0 }
 0x122   : > { %v1178_v7 = vpop.f32.mrf.mxu2 }
 0x12a   : > { %v1181_v10 = vpop.f32.mrf.mxu2 }
 0x132   : > { %v1183_v11 = vpop.f32.mrf.mxu2 }
 0x13a   : > { %v1186_v15 = vpop.f32.mrf.mxu2 }
 0x142   : > { %v1188_v24 = vpop.f32.mrf.mxu2 }
 0x14a   : > { %v1191_v29 = vpop.f32.mrf.mxu2 }
 0x152   : > { %v1193_v35 = vpop.f32.mrf.mxu2 }
 0x15a   : > { %v1196_v44 = vpop.f32.mrf.mxu2 }
 0x162   : > { %v1198_v50 = vpop.f32.mrf.mxu2 }
 0x166   : > { %v1127_v12 = vpop.f32.mrf.mxu1 }
 0x167   : > { %v1128_v14 = vadd.f32 %v3470_v13, %v1127_v12 }
 0x169   : > { %v1177_v17 = vadd.f32 %v1176_v4, %v1128_v14 }
 0x16a   : > { %v1201_v58 = vpop.f32.mrf.mxu2 }
 0x16b   : > { %v1216_v20 = vmax.f32 %v1177_v17, 0.0 }
 0x16e   : > { %v1129_v16 = vpop.f32.mrf.mxu1 }
 0x16f   : > { %v1130_v18 = vadd.f32 %v3470_v13, %v1129_v16 }
 0x171   : > { %v1179_v19 = vadd.f32 %v1178_v7, %v1130_v18 }
 0x172   : > { %v1147_v40 = vpop.f32.mrf.mxu3  ;;  %v1203_v2 = vpop.f32.mrf.mxu2 }
 0x173   : > { %v1217_v21 = vmax.f32 %v1179_v19, 0.0  ;;  %v1148_v59 = vadd.f32 %v3470_v13, %v1147_v40 }
 0x175   : > { %v1232_v22 = vpack.c.bf16 %v1217_v21, %v1216_v20  ;;  %v1197_v61 = vadd.f32 %v1196_v44, %v1148_v59  ;;  %v3503_v59 = vld [vmem:[%s3492_s26 + $0x10] sm:$0xff] }
 0x176   : > { %v1132_v23 = vpop.f32.mrf.mxu1 }
 0x177   : > { %1328 = vmatmul.bf16.vlgmr.msrb.gmra.mxu3 %v1232_v22  ;;  %v1133_v25 = vadd.f32 %v3470_v13, %v1132_v23  ;;  %v1224_v0 = vmax.f32 %v1197_v61, 0.0  ;;  %v3511_v61 = vld [vmem:[%s3492_s26 + $0x20] sm:$0xff] }
 0x179   : > { %v1182_v27 = vadd.f32 %v1181_v10, %v1133_v25 }
 0x17a   : > { %v1149_v47 = vpop.f32.mrf.mxu3  ;;  %v1206_v7 = vpop.f32.mrf.mxu2 }
 0x17b   : > { %v1218_v31 = vmax.f32 %v1182_v27, 0.0  ;;  %v1150_v60 = vadd.f32 %v3470_v13, %v1149_v47 }
 0x17d   : > { %v1199_v62 = vadd.f32 %v1198_v50, %v1150_v60  ;;  %v3507_v60 = vld [vmem:[%s3492_s26 + $0x18] sm:$0xff] }
 0x17e   : > { %v1134_v26 = vpop.f32.mrf.mxu1 }
 0x17f   : > { %v1135_v28 = vadd.f32 %v3470_v13, %v1134_v26  ;;  %v1225_v1 = vmax.f32 %v1199_v62, 0.0  ;;  %v2760_v62 = vld [vmem:[%s3626_s7 + $0x38] sm:$0xff] }
 0x180   : > { %1566 = vmatpush.bf16.msrb.mxu1 %v2760_v62 }
 0x181   : > { %v1184_v30 = vadd.f32 %v1183_v11, %v1135_v28  ;;  %v1236_v3 = vpack.c.bf16 %v1225_v1, %v1224_v0  ;;  %v2759_v0 = vld [vmem:[%s3626_s7 + $0x30] sm:$0xff]  ;;  %v2758_v1 = vld [vmem:[%s3626_s7 + $0x28] sm:$0xff] }
 0x182   : > { %v1152_v56 = vpop.f32.mrf.mxu3 }
 0x183   : > { %v1219_v32 = vmax.f32 %v1184_v30, 0.0  ;;  %v1153_v5 = vadd.f32 %v3470_v13, %v1152_v56 }
 0x184   : > { %1567 = vmatpush.bf16.msrb.mxu1 %v2759_v0 }
 0x185   : > { %v1233_v33 = vpack.c.bf16 %v1219_v32, %v1218_v31  ;;  %v1202_v8 = vadd.f32 %v1201_v58, %v1153_v5  ;;  %v3499_v58 = vld [vmem:[%s3492_s26 + $0x8] sm:$0xff]  ;;  %v2755_v5 = vld [vmem:[%s3626_s7 + $0x10] sm:$0xff] }
 0x186   : > { %v1137_v34 = vpop.f32.mrf.mxu1 }
 0x187   : > { %1333 = vmatmul.bf16.gmra.mxu3 %v1233_v33  ;;  %v1138_v36 = vadd.f32 %v3470_v13, %v1137_v34  ;;  %v1226_v10 = vmax.f32 %v1202_v8, 0.0  ;;  %v3547_v8 = vld [vmem:[%s3492_s26 + $0x38] sm:$0xff] }
 0x188   : > { %1568 = vmatpush.bf16.msrb.mxu1 %v2758_v1 }
 0x189   : > { %v1187_v38 = vadd.f32 %v1186_v15, %v1138_v36  ;;  %v1208_v15 = vpop.f32.mrf.mxu2 }
 0x18a   : > { %v1154_v63 = vpop.f32.mrf.mxu3 }
 0x18b   : > { %v1220_v42 = vmax.f32 %v1187_v38, 0.0  ;;  %v1155_v6 = vadd.f32 %v3470_v13, %v1154_v63  ;;  %v3518_v63 = vld [vmem:[%s3492_s26 + $0x28] sm:$0xff] }
 0x18d   : > { %v1204_v9 = vadd.f32 %v1203_v2, %v1155_v6  ;;  %v2757_v2 = vld [vmem:[%s3626_s7 + $0x20] sm:$0xff]  ;;  %v2754_v6 = vld [vmem:[%s3626_s7 + $0x8] sm:$0xff] }
 0x18e   : > { %v1139_v37 = vpop.f32.mrf.mxu1  ;;  %1569 = vmatpush.bf16.msrb.mxu1 %v2757_v2 }
 0x18f   : > { %v1140_v39 = vadd.f32 %v3470_v13, %v1139_v37  ;;  %v1227_v11 = vmax.f32 %v1204_v9, 0.0 }
 0x191   : > { %v1189_v41 = vadd.f32 %v1188_v24, %v1140_v39  ;;  %v1237_v14 = vpack.c.bf16 %v1227_v11, %v1226_v10  ;;  %v1211_v21 = vpop.f32.mrf.mxu2  ;;  %v2893_v10 = vld [vmem:[#allocation3] ss:$0 sm:$0xff] }
 0x192   : > { %v1157_v4 = vpop.f32.mrf.mxu3 }
 0x193   : > { %v1221_v43 = vmax.f32 %v1189_v41, 0.0  ;;  %v1158_v16 = vadd.f32 %v3470_v13, %v1157_v4  ;;  %v3534_v4 = vld [vmem:[%s3492_s26 + $0x30] sm:$0xff] }
 0x195   : > { %v1234_v45 = vpack.c.bf16 %v1221_v43, %v1220_v42  ;;  %v1207_v19 = vadd.f32 %v1206_v7, %v1158_v16  ;;  %v2753_v7 = vld [vmem:[%s3626_s7] sm:$0xff] }
 0x196   : > { %v1142_v46 = vpop.f32.mrf.mxu1 }
 0x197   : > { %1338 = vmatmul.bf16.gmra.mxu3 %v1234_v45  ;;  %v1143_v48 = vadd.f32 %v3470_v13, %v1142_v46  ;;  %v1228_v22 = vmax.f32 %v1207_v19, 0.0 }
 0x199   : > { %v1192_v51 = vadd.f32 %v1191_v29, %v1143_v48  ;;  %v1213_v28 = vpop.f32.mrf.mxu2 }
 0x19a   : > { %v1159_v12 = vpop.f32.mrf.mxu3 }
 0x19b   : > { %v1222_v54 = vmax.f32 %v1192_v51, 0.0  ;;  %v1160_v17 = vadd.f32 %v3470_v13, %v1159_v12 }
 0x19d   : > { %v1209_v20 = vadd.f32 %v1208_v15, %v1160_v17 }
 0x19e   : > { %v1144_v49 = vpop.f32.mrf.mxu1 }
 0x19f   : > { %v1145_v52 = vadd.f32 %v3470_v13, %v1144_v49  ;;  %v1229_v23 = vmax.f32 %v1209_v20, 0.0 }
 0x1a1   : > { %v1194_v53 = vadd.f32 %v1193_v35, %v1145_v52  ;;  %v1238_v24 = vpack.c.bf16 %v1229_v23, %v1228_v22 }
 0x1a2   : > { %v1162_v18 = vpop.f32.mrf.mxu3 }
 0x1a3   : > { %v1223_v55 = vmax.f32 %v1194_v53, 0.0  ;;  %v1163_v26 = vadd.f32 %v3470_v13, %v1162_v18 }
 0x1a5   : > { %v1235_v57 = vpack.c.bf16 %v1223_v55, %v1222_v54  ;;  %v1212_v29 = vadd.f32 %v1211_v21, %v1163_v26 }
 0x1a7   : > { %1343 = vmatmul.bf16.gmra.mxu3 %v1235_v57  ;;  %v1230_v31 = vmax.f32 %v1212_v29, 0.0  ;;  %v3495_v57 = vld [vmem:[%s3492_s26] sm:$0xff]  ;;  %s2302_s26 = sshll.u32 %s3649_s19, 3 }
 0x1a8   : > { %s3598_s24 = scalar_lea.vmem %s3647_s27, %s2302_s26 }
 0x1aa   : > { %v1164_v25 = vpop.f32.mrf.mxu3 }
 0x1ab   : > { %v1165_v27 = vadd.f32 %v3470_v13, %v1164_v25 }
 0x1ad   : > { %v1214_v30 = vadd.f32 %v1213_v28, %v1165_v27 }
 0x1af   : > { %v1231_v32 = vmax.f32 %v1214_v30, 0.0 }
 0x1b1   : > { %v1239_v33 = vpack.c.bf16 %v1231_v32, %v1230_v31 }
 0x1b7   : > { %1348 = vmatmul.bf16.gmra.mxu3 %v1236_v3  ;;  %v2756_v3 = vld [vmem:[%s3626_s7 + $0x18] sm:$0xff] }
 0x1b8   : > { %1570 = vmatpush.bf16.msrb.mxu1 %v2756_v3 }
 0x1bc   : > { %1571 = vmatpush.bf16.msrb.mxu1 %v2755_v5 }
 0x1c0   : > { %1572 = vmatpush.bf16.msrb.mxu1 %v2754_v6 }
 0x1c4   : > { %1573 = vmatpush.bf16.msrb.mxu1 %v2753_v7 }
 0x1c7   : > { %1353 = vmatmul.bf16.gmra.mxu3 %v1237_v14 }
 0x1d7   : > { %1358 = vmatmul.bf16.gmra.mxu3 %v1238_v24 }
 0x1e7   : > { %1363 = vmatmul.bf16.gmra.mxu3 %v1239_v33 }
 0x1fa   : > { %v1329_v34 = vpop.f32.mrf.mxu3 }
 0x202   : > { %v1331_v35 = vpop.f32.mrf.mxu3 }
 0x203   : > { %v1369_v56 = vpack.c.bf16 %v1331_v35, %v1329_v34 }
 0x20a   : > { %v1334_v36 = vpop.f32.mrf.mxu3 }
 0x212   : > { %v1336_v37 = vpop.f32.mrf.mxu3 }
 0x213   : > { %v1370_v55 = vpack.c.bf16 %v1336_v37, %v1334_v36 }
 0x21a   : > { %v1339_v38 = vpop.f32.mrf.mxu3 }
 0x222   : > { %v1341_v39 = vpop.f32.mrf.mxu3 }
 0x223   : > { %v1371_v54 = vpack.c.bf16 %v1341_v39, %v1339_v38 }
 0x22a   : > { %v1344_v40 = vpop.f32.mrf.mxu3 }
 0x232   : > { %v1346_v41 = vpop.f32.mrf.mxu3 }
 0x233   : > { %v1372_v53 = vpack.c.bf16 %v1346_v41, %v1344_v40 }
 0x23a   : > { %v1349_v42 = vpop.f32.mrf.mxu3 }
 0x242   : > { %v1351_v43 = vpop.f32.mrf.mxu3 }
 0x243   : > { %v1373_v52 = vpack.c.bf16 %v1351_v43, %v1349_v42 }
 0x24a   : > { %v1354_v44 = vpop.f32.mrf.mxu3 }
 0x252   : > { %v1356_v45 = vpop.f32.mrf.mxu3 }
 0x253   : > { %v1374_v51 = vpack.c.bf16 %v1356_v45, %v1354_v44 }
 0x25a   : > { %v1359_v13 = vpop.f32.mrf.mxu3 }
 0x262   : > { %v1361_v46 = vpop.f32.mrf.mxu3 }
 0x263   : > { %v1375_v50 = vpack.c.bf16 %v1361_v46, %v1359_v13 }
 0x26a   : > { %v1364_v47 = vpop.f32.mrf.mxu3 }
 0x272   : > { %v1366_v48 = vpop.f32.mrf.mxu3 }
 0x273   : > { %v1376_v49 = vpack.c.bf16 %v1366_v48, %v1364_v47 }
 0x275   : > { %1429 = vmatpush.bf16.msrb.mxu0 %v1376_v49 }
 0x279   : > { %1430 = vmatpush.bf16.msrb.mxu0 %v1375_v50 }
 0x27d   : > { %1431 = vmatpush.bf16.msrb.mxu0 %v1374_v51 }
 0x281   : > { %1432 = vmatpush.bf16.msrb.mxu0 %v1373_v52 }
 0x285   : > { %1433 = vmatpush.bf16.msrb.mxu0 %v1372_v53 }
 0x289   : > { %1434 = vmatpush.bf16.msrb.mxu0 %v1371_v54 }
 0x28d   : > { %1435 = vmatpush.bf16.msrb.mxu0 %v1370_v55 }
 0x291   : > { %1436 = vmatpush.bf16.msrb.mxu0 %v1369_v56 }
 0x294   : > { %1437 = vmatmul.bf16.vlgmr.msrb.gmra.mxu0 %v3495_v57 }
 0x2a4   : > { %1442 = vmatmul.bf16.gmra.mxu0 %v3499_v58 }
 0x2b4   : > { %1447 = vmatmul.bf16.gmra.mxu0 %v3503_v59 }
 0x2c4   : > { %1452 = vmatmul.bf16.gmra.mxu0 %v3507_v60 }
 0x2d4   : > { %1457 = vmatmul.bf16.gmra.mxu0 %v3511_v61 }
 0x2e4   : > { %1462 = vmatmul.bf16.gmra.mxu0 %v3518_v63 }
 0x2f4   : > { %1467 = vmatmul.bf16.gmra.mxu0 %v3534_v4 }
 0x304   : > { %1472 = vmatmul.bf16.gmra.mxu0 %v3547_v8 }
 0x311   : > { %v1438_v9 = vpop.f32.mrf.mxu0 }
 0x312   : > { %v1439_v11 = vadd.f32 %v2893_v10, %v1438_v9 }
 0x314   : > { %v1478_v15 = vmax.f32 %v1439_v11, 0.0 }
 0x319   : > { %v1440_v12 = vpop.f32.mrf.mxu0 }
 0x31a   : > { %v1441_v14 = vadd.f32 %v2893_v10, %v1440_v12 }
 0x31c   : > { %v1479_v16 = vmax.f32 %v1441_v14, 0.0 }
 0x31e   : > { %v1494_v17 = vpack.c.bf16 %v1479_v16, %v1478_v15 }
 0x320   : > { %1574 = vmatmul.bf16.vlgmr.msrb.gmra.mxu1 %v1494_v17 }
 0x321   : > { %v1443_v18 = vpop.f32.mrf.mxu0 }
 0x322   : > { %v1444_v19 = vadd.f32 %v2893_v10, %v1443_v18 }
 0x324   : > { %v1480_v22 = vmax.f32 %v1444_v19, 0.0 }
 0x329   : > { %v1445_v20 = vpop.f32.mrf.mxu0 }
 0x32a   : > { %v1446_v21 = vadd.f32 %v2893_v10, %v1445_v20 }
 0x32c   : > { %v1481_v23 = vmax.f32 %v1446_v21, 0.0 }
 0x32e   : > { %v1495_v24 = vpack.c.bf16 %v1481_v23, %v1480_v22 }
 0x330   : > { %1579 = vmatmul.bf16.gmra.mxu1 %v1495_v24 }
 0x331   : > { %v1448_v25 = vpop.f32.mrf.mxu0 }
 0x332   : > { %v1449_v26 = vadd.f32 %v2893_v10, %v1448_v25 }
 0x334   : > { %v1482_v29 = vmax.f32 %v1449_v26, 0.0 }
 0x339   : > { %v1450_v27 = vpop.f32.mrf.mxu0 }
 0x33a   : > { %v1451_v28 = vadd.f32 %v2893_v10, %v1450_v27 }
 0x33c   : > { %v1483_v30 = vmax.f32 %v1451_v28, 0.0 }
 0x33e   : > { %v1496_v31 = vpack.c.bf16 %v1483_v30, %v1482_v29 }
 0x340   : > { %1584 = vmatmul.bf16.gmra.mxu1 %v1496_v31 }
 0x341   : > { %v1453_v32 = vpop.f32.mrf.mxu0 }
 0x342   : > { %v1454_v33 = vadd.f32 %v2893_v10, %v1453_v32 }
 0x344   : > { %v1484_v36 = vmax.f32 %v1454_v33, 0.0 }
 0x349   : > { %v1455_v34 = vpop.f32.mrf.mxu0 }
 0x34a   : > { %v1456_v35 = vadd.f32 %v2893_v10, %v1455_v34 }
 0x34c   : > { %v1485_v37 = vmax.f32 %v1456_v35, 0.0  ;;  %v2768_v35 = vld [vmem:[#allocation7 + $0x38] sm:$0xff] }
 0x34d   : > { %1768 = vmatpush.bf16.msra.mxu3 %v2768_v35 }
 0x34e   : > { %v1497_v38 = vpack.c.bf16 %v1485_v37, %v1484_v36  ;;  %v2767_v36 = vld [vmem:[#allocation7 + $0x30] sm:$0xff]  ;;  %v2766_v37 = vld [vmem:[#allocation7 + $0x28] sm:$0xff] }
 0x350   : > { %1589 = vmatmul.bf16.gmra.mxu1 %v1497_v38  ;;  %v2765_v38 = vld [vmem:[#allocation7 + $0x20] sm:$0xff] }
 0x351   : > { %v1458_v39 = vpop.f32.mrf.mxu0  ;;  %1769 = vmatpush.bf16.msra.mxu3 %v2767_v36 }
 0x352   : > { %v1459_v40 = vadd.f32 %v2893_v10, %v1458_v39  ;;  %v2764_v39 = vld [vmem:[#allocation7 + $0x18] sm:$0xff] }
 0x354   : > { %v1486_v43 = vmax.f32 %v1459_v40, 0.0  ;;  %v3558_v40 = vld [vmem:[#allocation5] ss:$0 sm:$0xff] }
 0x355   : > { %1770 = vmatpush.bf16.msra.mxu3 %v2766_v37 }
 0x359   : > { %v1460_v41 = vpop.f32.mrf.mxu0  ;;  %1771 = vmatpush.bf16.msra.mxu3 %v2765_v38  ;;  %v2770_v38 = vld [vmem:[#allocation10 + $0x8] sm:$0xff] }
 0x35a   : > { %v1461_v42 = vadd.f32 %v2893_v10, %v1460_v41 }
 0x35c   : > { %v1487_v44 = vmax.f32 %v1461_v42, 0.0 }
 0x35d   : > { %1772 = vmatpush.bf16.msra.mxu3 %v2764_v39 }
 0x35e   : > { %v1498_v45 = vpack.c.bf16 %v1487_v44, %v1486_v43 }
 0x360   : > { %1594 = vmatmul.bf16.gmra.mxu1 %v1498_v45 }
 0x361   : > { %v1463_v13 = vpop.f32.mrf.mxu0 }
 0x362   : > { %v1464_v46 = vadd.f32 %v2893_v10, %v1463_v13 }
 0x364   : > { %v1488_v49 = vmax.f32 %v1464_v46, 0.0 }
 0x369   : > { %v1465_v47 = vpop.f32.mrf.mxu0 }
 0x36a   : > { %v1466_v48 = vadd.f32 %v2893_v10, %v1465_v47 }
 0x36c   : > { %v1489_v50 = vmax.f32 %v1466_v48, 0.0 }
 0x36e   : > { %v1499_v51 = vpack.c.bf16 %v1489_v50, %v1488_v49  ;;  %v2776_v50 = vld [vmem:[#allocation10 + $0x38] sm:$0xff] }
 0x36f   : > { %1909 = vmatpush.bf16.msra.mxu0 %v2776_v50  ;;  %v2784_v50 = vld [vmem:[#allocation13 + $0x38] sm:$0xff] }
 0x370   : > { %1599 = vmatmul.bf16.gmra.mxu1 %v1499_v51 }
 0x371   : > { %v1468_v52 = vpop.f32.mrf.mxu0  ;;  %2050 = vmatpush.bf16.msra.mxu1 %v2784_v50 }
 0x372   : > { %v1469_v53 = vadd.f32 %v2893_v10, %v1468_v52 }
 0x374   : > { %v1490_v56 = vmax.f32 %v1469_v53, 0.0 }
 0x379   : > { %v1470_v54 = vpop.f32.mrf.mxu0 }
 0x37a   : > { %v1471_v55 = vadd.f32 %v2893_v10, %v1470_v54 }
 0x37c   : > { %v1491_v62 = vmax.f32 %v1471_v55, 0.0 }
 0x37e   : > { %v1500_v0 = vpack.c.bf16 %v1491_v62, %v1490_v56 }
 0x380   : > { %1604 = vmatmul.bf16.gmra.mxu1 %v1500_v0  ;;  %v2775_v0 = vld [vmem:[#allocation10 + $0x30] sm:$0xff] }
 0x381   : > { %v1473_v1 = vpop.f32.mrf.mxu0  ;;  %1910 = vmatpush.bf16.msra.mxu0 %v2775_v0  ;;  %v2783_v0 = vld [vmem:[#allocation13 + $0x30] sm:$0xff] }
 0x382   : > { %v1474_v2 = vadd.f32 %v2893_v10, %v1473_v1  ;;  %2051 = vmatpush.bf16.msra.mxu1 %v2783_v0 }
 0x384   : > { %v1492_v6 = vmax.f32 %v1474_v2, 0.0 }
 0x389   : > { %v1475_v3 = vpop.f32.mrf.mxu0 }
 0x38a   : > { %v1476_v5 = vadd.f32 %v2893_v10, %v1475_v3 }
 0x38c   : > { %v1493_v7 = vmax.f32 %v1476_v5, 0.0 }
 0x38e   : > { %v1501_v9 = vpack.c.bf16 %v1493_v7, %v1492_v6 }
 0x390   : > { %1609 = vmatmul.bf16.gmra.mxu1 %v1501_v9 }
 0x39d   : > { %v1575_v11 = vpop.f32.mrf.mxu1 }
 0x3a5   : > { %v1577_v12 = vpop.f32.mrf.mxu1 }
 0x3a6   : > { %v1615_v34 = vpack.c.bf16 %v1577_v12, %v1575_v11  ;;  %v2774_v11 = vld [vmem:[#allocation10 + $0x28] sm:$0xff] }
 0x3a7   : > { %1911 = vmatpush.bf16.msra.mxu0 %v2774_v11  ;;  %v2782_v11 = vld [vmem:[#allocation13 + $0x28] sm:$0xff] }
 0x3a8   : > { %2052 = vmatpush.bf16.msra.mxu1 %v2782_v11 }
 0x3ad   : > { %v1580_v14 = vpop.f32.mrf.mxu1 }
 0x3b5   : > { %v1582_v15 = vpop.f32.mrf.mxu1 }
 0x3b6   : > { %v1616_v33 = vpack.c.bf16 %v1582_v15, %v1580_v14 }
 0x3bd   : > { %v1585_v16 = vpop.f32.mrf.mxu1 }
 0x3c5   : > { %v1587_v17 = vpop.f32.mrf.mxu1 }
 0x3c6   : > { %v1617_v32 = vpack.c.bf16 %v1587_v17, %v1585_v16 }
 0x3cd   : > { %v1590_v18 = vpop.f32.mrf.mxu1 }
 0x3d5   : > { %v1592_v19 = vpop.f32.mrf.mxu1 }
 0x3d6   : > { %v1618_v31 = vpack.c.bf16 %v1592_v19, %v1590_v18 }
 0x3dd   : > { %v1595_v20 = vpop.f32.mrf.mxu1 }
 0x3e5   : > { %v1597_v21 = vpop.f32.mrf.mxu1 }
 0x3e6   : > { %v1619_v30 = vpack.c.bf16 %v1597_v21, %v1595_v20  ;;  %v2773_v20 = vld [vmem:[#allocation10 + $0x20] sm:$0xff] }
 0x3e7   : > { %1912 = vmatpush.bf16.msra.mxu0 %v2773_v20  ;;  %v2781_v20 = vld [vmem:[#allocation13 + $0x20] sm:$0xff] }
 0x3e8   : > { %2053 = vmatpush.bf16.msra.mxu1 %v2781_v20 }
 0x3ed   : > { %v1600_v22 = vpop.f32.mrf.mxu1 }
 0x3f5   : > { %v1602_v23 = vpop.f32.mrf.mxu1 }
 0x3f6   : > { %v1620_v29 = vpack.c.bf16 %v1602_v23, %v1600_v22 }
 0x3fd   : > { %v1605_v24 = vpop.f32.mrf.mxu1 }
 0x405   : > { %v1607_v25 = vpop.f32.mrf.mxu1 }
 0x406   : > { %v1621_v28 = vpack.c.bf16 %v1607_v25, %v1605_v24 }
 0x40d   : > { %v1610_v26 = vpop.f32.mrf.mxu1 }
 0x415   : > { %v1612_v10 = vpop.f32.mrf.mxu1 }
 0x416   : > { %v1622_v27 = vpack.c.bf16 %v1612_v10, %v1610_v26  ;;  %v2772_v10 = vld [vmem:[#allocation10 + $0x18] sm:$0xff] }
 0x417   : > { %1913 = vmatpush.bf16.msra.mxu0 %v2772_v10 }
 0x418   : > { %1627 = vmatpush.bf16.msra.mxu2 %v1622_v27 }
 0x41c   : > { %1628 = vmatpush.bf16.msra.mxu2 %v1621_v28  ;;  %v2771_v28 = vld [vmem:[#allocation10 + $0x10] sm:$0xff] }
 0x41d   : > { %1914 = vmatpush.bf16.msra.mxu0 %v2771_v28  ;;  %v2779_v28 = vld [vmem:[#allocation13 + $0x10] sm:$0xff] }
 0x420   : > { %1629 = vmatpush.bf16.msra.mxu2 %v1620_v29 }
 0x421   : > { %1915 = vmatpush.bf16.msra.mxu0 %v2770_v38  ;;  %v2777_v38 = vld [vmem:[#allocation13] sm:$0xff] }
 0x424   : > { %1630 = vmatpush.bf16.msra.mxu2 %v1619_v30 }
 0x428   : > { %1631 = vmatpush.bf16.msra.mxu2 %v1618_v31 }
 0x42c   : > { %1632 = vmatpush.bf16.msra.mxu2 %v1617_v32 }
 0x430   : > { %1633 = vmatpush.bf16.msra.mxu2 %v1616_v33 }
 0x434   : > { %1634 = vmatpush.bf16.msra.mxu2 %v1615_v34 }
 0x437   : > { %1635 = vmatmul.bf16.vlgmr.msra.gmra.mxu2 %v3495_v57  ;;  %v2763_v57 = vld [vmem:[#allocation7 + $0x10] sm:$0xff] }
 0x438   : > { %1773 = vmatpush.bf16.msra.mxu3 %v2763_v57 }
 0x447   : > { %1640 = vmatmul.bf16.gmra.mxu2 %v3499_v58  ;;  %v2762_v58 = vld [vmem:[#allocation7 + $0x8] sm:$0xff] }
 0x448   : > { %1774 = vmatpush.bf16.msra.mxu3 %v2762_v58 }
 0x457   : > { %1645 = vmatmul.bf16.gmra.mxu2 %v3503_v59  ;;  %v2761_v59 = vld [vmem:[#allocation7] sm:$0xff] }
 0x458   : > { %1775 = vmatpush.bf16.msra.mxu3 %v2761_v59  ;;  %v2769_v59 = vld [vmem:[#allocation10] sm:$0xff] }
 0x459   : > { %1916 = vmatpush.bf16.msra.mxu0 %v2769_v59 }
 0x467   : > { %1650 = vmatmul.bf16.gmra.mxu2 %v3507_v60 }
 0x477   : > { %1655 = vmatmul.bf16.gmra.mxu2 %v3511_v61 }
 0x487   : > { %1660 = vmatmul.bf16.gmra.mxu2 %v3518_v63 }
 0x497   : > { %1665 = vmatmul.bf16.gmra.mxu2 %v3534_v4 }
 0x4a7   : > { %1670 = vmatmul.bf16.gmra.mxu2 %v3547_v8 }
 0x4ba   : > { %v1636_v60 = vpop.f32.mrf.mxu2 }
 0x4bb   : > { %v1637_v61 = vadd.f32 %v3558_v40, %v1636_v60 }
 0x4bd   : > { %v1676_v42 = vmax.f32 %v1637_v61, 0.0 }
 0x4c2   : > { %v1638_v41 = vpop.f32.mrf.mxu2 }
 0x4c3   : > { %v1639_v63 = vadd.f32 %v3558_v40, %v1638_v41  ;;  %v3576_v41 = vld [vmem:[#allocation8] ss:$0 sm:$0xff] }
 0x4c5   : > { %v1677_v43 = vmax.f32 %v1639_v63, 0.0 }
 0x4c7   : > { %v1692_v44 = vpack.c.bf16 %v1677_v43, %v1676_v42 }
 0x4c9   : > { %1776 = vmatmul.bf16.vlgmr.msra.gmra.mxu3 %v1692_v44 }
 0x4ca   : > { %v1641_v45 = vpop.f32.mrf.mxu2 }
 0x4cb   : > { %v1642_v4 = vadd.f32 %v3558_v40, %v1641_v45 }
 0x4cd   : > { %v1678_v47 = vmax.f32 %v1642_v4, 0.0 }
 0x4d2   : > { %v1643_v13 = vpop.f32.mrf.mxu2 }
 0x4d3   : > { %v1644_v46 = vadd.f32 %v3558_v40, %v1643_v13 }
 0x4d5   : > { %v1679_v8 = vmax.f32 %v1644_v46, 0.0 }
 0x4d7   : > { %v1693_v48 = vpack.c.bf16 %v1679_v8, %v1678_v47 }
 0x4d9   : > { %1781 = vmatmul.bf16.gmra.mxu3 %v1693_v48 }
 0x4da   : > { %v1646_v49 = vpop.f32.mrf.mxu2 }
 0x4db   : > { %v1647_v51 = vadd.f32 %v3558_v40, %v1646_v49 }
 0x4dd   : > { %v1680_v54 = vmax.f32 %v1647_v51, 0.0 }
 0x4e2   : > { %v1648_v52 = vpop.f32.mrf.mxu2 }
 0x4e3   : > { %v1649_v53 = vadd.f32 %v3558_v40, %v1648_v52 }
 0x4e5   : > { %v1681_v55 = vmax.f32 %v1649_v53, 0.0 }
 0x4e7   : > { %v1694_v56 = vpack.c.bf16 %v1681_v55, %v1680_v54 }
 0x4e9   : > { %1786 = vmatmul.bf16.gmra.mxu3 %v1694_v56 }
 0x4ea   : > { %v1651_v62 = vpop.f32.mrf.mxu2 }
 0x4eb   : > { %v1652_v1 = vadd.f32 %v3558_v40, %v1651_v62 }
 0x4ed   : > { %v1682_v5 = vmax.f32 %v1652_v1, 0.0 }
 0x4f2   : > { %v1653_v2 = vpop.f32.mrf.mxu2 }
 0x4f3   : > { %v1654_v3 = vadd.f32 %v3558_v40, %v1653_v2 }
 0x4f5   : > { %v1683_v6 = vmax.f32 %v1654_v3, 0.0 }
 0x4f7   : > { %v1695_v7 = vpack.c.bf16 %v1683_v6, %v1682_v5 }
 0x4f9   : > { %1791 = vmatmul.bf16.gmra.mxu3 %v1695_v7 }
 0x4fa   : > { %v1656_v9 = vpop.f32.mrf.mxu2 }
 0x4fb   : > { %v1657_v12 = vadd.f32 %v3558_v40, %v1656_v9 }
 0x4fd   : > { %v1684_v16 = vmax.f32 %v1657_v12, 0.0 }
 0x502   : > { %v1658_v14 = vpop.f32.mrf.mxu2 }
 0x503   : > { %v1659_v15 = vadd.f32 %v3558_v40, %v1658_v14 }
 0x505   : > { %v1685_v17 = vmax.f32 %v1659_v15, 0.0 }
 0x507   : > { %v1696_v18 = vpack.c.bf16 %v1685_v17, %v1684_v16 }
 0x509   : > { %1796 = vmatmul.bf16.gmra.mxu3 %v1696_v18 }
 0x50a   : > { %v1661_v19 = vpop.f32.mrf.mxu2 }
 0x50b   : > { %v1662_v21 = vadd.f32 %v3558_v40, %v1661_v19 }
 0x50d   : > { %v1686_v24 = vmax.f32 %v1662_v21, 0.0 }
 0x512   : > { %v1663_v22 = vpop.f32.mrf.mxu2 }
 0x513   : > { %v1664_v23 = vadd.f32 %v3558_v40, %v1663_v22 }
 0x515   : > { %v1687_v25 = vmax.f32 %v1664_v23, 0.0 }
 0x517   : > { %v1697_v26 = vpack.c.bf16 %v1687_v25, %v1686_v24 }
 0x519   : > { %1801 = vmatmul.bf16.gmra.mxu3 %v1697_v26 }
 0x51a   : > { %v1666_v27 = vpop.f32.mrf.mxu2 }
 0x51b   : > { %v1667_v29 = vadd.f32 %v3558_v40, %v1666_v27  ;;  %v2780_v27 = vld [vmem:[#allocation13 + $0x18] sm:$0xff] }
 0x51c   : > { %2054 = vmatpush.bf16.msra.mxu1 %v2780_v27 }
 0x51d   : > { %v1688_v32 = vmax.f32 %v1667_v29, 0.0 }
 0x520   : > { %2055 = vmatpush.bf16.msra.mxu1 %v2779_v28 }
 0x522   : > { %v1668_v30 = vpop.f32.mrf.mxu2 }
 0x523   : > { %v1669_v31 = vadd.f32 %v3558_v40, %v1668_v30 }
 0x525   : > { %v1689_v33 = vmax.f32 %v1669_v31, 0.0 }
 0x527   : > { %v1698_v34 = vpack.c.bf16 %v1689_v33, %v1688_v32 }
 0x529   : > { %1806 = vmatmul.bf16.gmra.mxu3 %v1698_v34 }
 0x52a   : > { %v1671_v35 = vpop.f32.mrf.mxu2 }
 0x52b   : > { %v1672_v36 = vadd.f32 %v3558_v40, %v1671_v35 }
 0x52d   : > { %v1690_v57 = vmax.f32 %v1672_v36, 0.0 }
 0x532   : > { %v1673_v37 = vpop.f32.mrf.mxu2 }
 0x533   : > { %v1674_v39 = vadd.f32 %v3558_v40, %v1673_v37  ;;  %v2778_v37 = vld [vmem:[#allocation13 + $0x8] sm:$0xff] }
 0x534   : > { %2056 = vmatpush.bf16.msra.mxu1 %v2778_v37 }
 0x535   : > { %v1691_v58 = vmax.f32 %v1674_v39, 0.0 }
 0x537   : > { %v1699_v60 = vpack.c.bf16 %v1691_v58, %v1690_v57 }
 0x538   : > { %2057 = vmatpush.bf16.msra.mxu1 %v2777_v38  ;;  %v2897_v38 = vld [vmem:[#allocation14] ss:$0 sm:$0xff] }
 0x539   : > { %1811 = vmatmul.bf16.gmra.mxu3 %v1699_v60 }
 0x54c   : > { %v1777_v61 = vpop.f32.mrf.mxu3 }
 0x54d   : > { %v1778_v63 = vadd.f32 %v3576_v41, %v1777_v61 }
 0x54f   : > { %v1817_v44 = vmax.f32 %v1778_v63, 0.0 }
 0x554   : > { %v1779_v42 = vpop.f32.mrf.mxu3 }
 0x555   : > { %v1780_v43 = vadd.f32 %v3576_v41, %v1779_v42  ;;  %v2896_v42 = vld [vmem:[#allocation11] ss:$0 sm:$0xff] }
 0x557   : > { %v1818_v45 = vmax.f32 %v1780_v43, 0.0 }
 0x559   : > { %v1833_v4 = vpack.c.bf16 %v1818_v45, %v1817_v44 }
 0x55b   : > { %1917 = vmatmul.bf16.vlgmr.msra.gmra.mxu0 %v1833_v4 }
 0x55c   : > { %v1782_v40 = vpop.f32.mrf.mxu3 }
 0x55d   : > { %v1783_v13 = vadd.f32 %v3576_v41, %v1782_v40 }
 0x55f   : > { %v1819_v8 = vmax.f32 %v1783_v13, 0.0 }
 0x564   : > { %v1784_v46 = vpop.f32.mrf.mxu3 }
 0x565   : > { %v1785_v47 = vadd.f32 %v3576_v41, %v1784_v46 }
 0x567   : > { %v1820_v48 = vmax.f32 %v1785_v47, 0.0 }
 0x569   : > { %v1834_v49 = vpack.c.bf16 %v1820_v48, %v1819_v8 }
 0x56b   : > { %1922 = vmatmul.bf16.gmra.mxu0 %v1834_v49 }
 0x56c   : > { %v1787_v51 = vpop.f32.mrf.mxu3 }
 0x56d   : > { %v1788_v52 = vadd.f32 %v3576_v41, %v1787_v51 }
 0x56f   : > { %v1821_v55 = vmax.f32 %v1788_v52, 0.0 }
 0x574   : > { %v1789_v53 = vpop.f32.mrf.mxu3 }
 0x575   : > { %v1790_v54 = vadd.f32 %v3576_v41, %v1789_v53 }
 0x577   : > { %v1822_v56 = vmax.f32 %v1790_v54, 0.0 }
 0x579   : > { %v1835_v62 = vpack.c.bf16 %v1822_v56, %v1821_v55 }
 0x57b   : > { %1927 = vmatmul.bf16.gmra.mxu0 %v1835_v62 }
 0x57c   : > { %v1792_v1 = vpop.f32.mrf.mxu3 }
 0x57d   : > { %v1793_v2 = vadd.f32 %v3576_v41, %v1792_v1 }
 0x57f   : > { %v1823_v6 = vmax.f32 %v1793_v2, 0.0 }
 0x584   : > { %v1794_v3 = vpop.f32.mrf.mxu3 }
 0x585   : > { %v1795_v5 = vadd.f32 %v3576_v41, %v1794_v3 }
 0x587   : > { %v1824_v7 = vmax.f32 %v1795_v5, 0.0 }
 0x589   : > { %v1836_v9 = vpack.c.bf16 %v1824_v7, %v1823_v6 }
 0x58b   : > { %1932 = vmatmul.bf16.gmra.mxu0 %v1836_v9 }
 0x58c   : > { %v1797_v12 = vpop.f32.mrf.mxu3 }
 0x58d   : > { %v1798_v14 = vadd.f32 %v3576_v41, %v1797_v12 }
 0x58f   : > { %v1825_v17 = vmax.f32 %v1798_v14, 0.0 }
 0x594   : > { %v1799_v15 = vpop.f32.mrf.mxu3 }
 0x595   : > { %v1800_v16 = vadd.f32 %v3576_v41, %v1799_v15 }
 0x597   : > { %v1826_v18 = vmax.f32 %v1800_v16, 0.0 }
 0x599   : > { %v1837_v19 = vpack.c.bf16 %v1826_v18, %v1825_v17 }
 0x59b   : > { %1937 = vmatmul.bf16.gmra.mxu0 %v1837_v19 }
 0x59c   : > { %v1802_v21 = vpop.f32.mrf.mxu3 }
 0x59d   : > { %v1803_v22 = vadd.f32 %v3576_v41, %v1802_v21 }
 0x59f   : > { %v1827_v25 = vmax.f32 %v1803_v22, 0.0 }
 0x5a4   : > { %v1804_v23 = vpop.f32.mrf.mxu3 }
 0x5a5   : > { %v1805_v24 = vadd.f32 %v3576_v41, %v1804_v23 }
 0x5a7   : > { %v1828_v26 = vmax.f32 %v1805_v24, 0.0 }
 0x5a9   : > { %v1838_v10 = vpack.c.bf16 %v1828_v26, %v1827_v25 }
 0x5ab   : > { %1942 = vmatmul.bf16.gmra.mxu0 %v1838_v10 }
 0x5ac   : > { %v1807_v29 = vpop.f32.mrf.mxu3 }
 0x5ad   : > { %v1808_v30 = vadd.f32 %v3576_v41, %v1807_v29 }
 0x5af   : > { %v1829_v33 = vmax.f32 %v1808_v30, 0.0 }
 0x5b4   : > { %v1809_v31 = vpop.f32.mrf.mxu3 }
 0x5b5   : > { %v1810_v32 = vadd.f32 %v3576_v41, %v1809_v31 }
 0x5b7   : > { %v1830_v34 = vmax.f32 %v1810_v32, 0.0 }
 0x5b9   : > { %v1839_v35 = vpack.c.bf16 %v1830_v34, %v1829_v33 }
 0x5bb   : > { %1947 = vmatmul.bf16.gmra.mxu0 %v1839_v35 }
 0x5bc   : > { %v1812_v36 = vpop.f32.mrf.mxu3 }
 0x5bd   : > { %v1813_v39 = vadd.f32 %v3576_v41, %v1812_v36 }
 0x5bf   : > { %v1831_v59 = vmax.f32 %v1813_v39, 0.0 }
 0x5c4   : > { %v1814_v57 = vpop.f32.mrf.mxu3 }
 0x5c5   : > { %v1815_v58 = vadd.f32 %v3576_v41, %v1814_v57 }
 0x5c7   : > { %v1832_v60 = vmax.f32 %v1815_v58, 0.0 }
 0x5c9   : > { %v1840_v61 = vpack.c.bf16 %v1832_v60, %v1831_v59 }
 0x5cb   : > { %1952 = vmatmul.bf16.gmra.mxu0 %v1840_v61 }
 0x5d8   : > { %v1918_v63 = vpop.f32.mrf.mxu0 }
 0x5d9   : > { %v1919_v43 = vadd.f32 %v2896_v42, %v1918_v63 }
 0x5db   : > { %v1958_v4 = vmax.f32 %v1919_v43, 0.0 }
 0x5e0   : > { %v1920_v44 = vpop.f32.mrf.mxu0 }
 0x5e1   : > { %v1921_v45 = vadd.f32 %v2896_v42, %v1920_v44 }
 0x5e3   : > { %v1959_v40 = vmax.f32 %v1921_v45, 0.0 }
 0x5e5   : > { %v1974_v13 = vpack.c.bf16 %v1959_v40, %v1958_v4 }
 0x5e7   : > { %2058 = vmatmul.bf16.vlgmr.msra.gmra.mxu1 %v1974_v13 }
 0x5e8   : > { %v1923_v46 = vpop.f32.mrf.mxu0 }
 0x5e9   : > { %v1924_v47 = vadd.f32 %v2896_v42, %v1923_v46 }
 0x5eb   : > { %v1960_v49 = vmax.f32 %v1924_v47, 0.0 }
 0x5f0   : > { %v1925_v8 = vpop.f32.mrf.mxu0 }
 0x5f1   : > { %v1926_v48 = vadd.f32 %v2896_v42, %v1925_v8 }
 0x5f3   : > { %v1961_v50 = vmax.f32 %v1926_v48, 0.0 }
 0x5f5   : > { %v1975_v41 = vpack.c.bf16 %v1961_v50, %v1960_v49 }
 0x5f7   : > { %2063 = vmatmul.bf16.gmra.mxu1 %v1975_v41 }
 0x5f8   : > { %v1928_v51 = vpop.f32.mrf.mxu0 }
 0x5f9   : > { %v1929_v52 = vadd.f32 %v2896_v42, %v1928_v51 }
 0x5fb   : > { %v1962_v55 = vmax.f32 %v1929_v52, 0.0 }
 0x600   : > { %v1930_v53 = vpop.f32.mrf.mxu0 }
 0x601   : > { %v1931_v54 = vadd.f32 %v2896_v42, %v1930_v53 }
 0x603   : > { %v1963_v56 = vmax.f32 %v1931_v54, 0.0 }
 0x605   : > { %v1976_v62 = vpack.c.bf16 %v1963_v56, %v1962_v55 }
 0x607   : > { %2068 = vmatmul.bf16.gmra.mxu1 %v1976_v62 }
 0x608   : > { %v1933_v0 = vpop.f32.mrf.mxu0 }
 0x609   : > { %v1934_v1 = vadd.f32 %v2896_v42, %v1933_v0 }
 0x60b   : > { %v1964_v5 = vmax.f32 %v1934_v1, 0.0 }
 0x610   : > { %v1935_v2 = vpop.f32.mrf.mxu0 }
 0x611   : > { %v1936_v3 = vadd.f32 %v2896_v42, %v1935_v2 }
 0x613   : > { %v1965_v6 = vmax.f32 %v1936_v3, 0.0 }
 0x615   : > { %v1977_v7 = vpack.c.bf16 %v1965_v6, %v1964_v5 }
 0x617   : > { %2073 = vmatmul.bf16.gmra.mxu1 %v1977_v7 }
 0x618   : > { %v1938_v9 = vpop.f32.mrf.mxu0 }
 0x619   : > { %v1939_v11 = vadd.f32 %v2896_v42, %v1938_v9 }
 0x61b   : > { %v1966_v15 = vmax.f32 %v1939_v11, 0.0 }
 0x620   : > { %v1940_v12 = vpop.f32.mrf.mxu0 }
 0x621   : > { %v1941_v14 = vadd.f32 %v2896_v42, %v1940_v12 }
 0x623   : > { %v1967_v16 = vmax.f32 %v1941_v14, 0.0 }
 0x625   : > { %v1978_v17 = vpack.c.bf16 %v1967_v16, %v1966_v15 }
 0x627   : > { %2078 = vmatmul.bf16.gmra.mxu1 %v1978_v17 }
 0x628   : > { %v1943_v18 = vpop.f32.mrf.mxu0 }
 0x629   : > { %v1944_v19 = vadd.f32 %v2896_v42, %v1943_v18 }
 0x62b   : > { %v1968_v22 = vmax.f32 %v1944_v19, 0.0 }
 0x630   : > { %v1945_v20 = vpop.f32.mrf.mxu0 }
 0x631   : > { %v1946_v21 = vadd.f32 %v2896_v42, %v1945_v20 }
 0x633   : > { %v1969_v23 = vmax.f32 %v1946_v21, 0.0 }
 0x635   : > { %v1979_v24 = vpack.c.bf16 %v1969_v23, %v1968_v22 }
 0x637   : > { %2083 = vmatmul.bf16.gmra.mxu1 %v1979_v24 }
 0x638   : > { %v1948_v25 = vpop.f32.mrf.mxu0 }
 0x639   : > { %v1949_v26 = vadd.f32 %v2896_v42, %v1948_v25 }
 0x63b   : > { %v1970_v28 = vmax.f32 %v1949_v26, 0.0 }
 0x640   : > { %v1950_v10 = vpop.f32.mrf.mxu0 }
 0x641   : > { %v1951_v27 = vadd.f32 %v2896_v42, %v1950_v10 }
 0x643   : > { %v1971_v29 = vmax.f32 %v1951_v27, 0.0 }
 0x645   : > { %v1980_v30 = vpack.c.bf16 %v1971_v29, %v1970_v28 }
 0x647   : > { %2088 = vmatmul.bf16.gmra.mxu1 %v1980_v30 }
 0x648   : > { %v1953_v31 = vpop.f32.mrf.mxu0 }
 0x649   : > { %v1954_v32 = vadd.f32 %v2896_v42, %v1953_v31 }
 0x64b   : > { %v1972_v35 = vmax.f32 %v1954_v32, 0.0 }
 0x650   : > { %v1955_v33 = vpop.f32.mrf.mxu0 }
 0x651   : > { %v1956_v34 = vadd.f32 %v2896_v42, %v1955_v33 }
 0x653   : > { %v1973_v36 = vmax.f32 %v1956_v34, 0.0 }
 0x655   : > { %v1981_v37 = vpack.c.bf16 %v1973_v36, %v1972_v35 }
 0x657   : > { %2093 = vmatmul.bf16.gmra.mxu1 %v1981_v37 }
 0x664   : > { %v2059_v39 = vpop.f32.mrf.mxu1 }
 0x665   : > { %v2060_v57 = vadd.f32 %v2897_v38, %v2059_v39 }
 0x667   : > { %2099 = vst [vmem:[%s3598_s24] sm:$0xff] %v2060_v57 }
 0x66c   : > { %v2061_v58 = vpop.f32.mrf.mxu1 }
 0x66d   : > { %v2062_v59 = vadd.f32 %v2897_v38, %v2061_v58 }
 0x66f   : > { %2100 = vst [vmem:[%s3598_s24 + $0x8] sm:$0xff] %v2062_v59 }
 0x674   : > { %v2064_v60 = vpop.f32.mrf.mxu1 }
 0x675   : > { %v2065_v61 = vadd.f32 %v2897_v38, %v2064_v60 }
 0x677   : > { %2101 = vst [vmem:[%s3598_s24 + $0x10] sm:$0xff] %v2065_v61 }
 0x67c   : > { %v2066_v63 = vpop.f32.mrf.mxu1 }
 0x67d   : > { %v2067_v42 = vadd.f32 %v2897_v38, %v2066_v63 }
 0x67f   : > { %2102 = vst [vmem:[%s3598_s24 + $0x18] sm:$0xff] %v2067_v42 }
 0x684   : > { %v2069_v43 = vpop.f32.mrf.mxu1 }
 0x685   : > { %v2070_v44 = vadd.f32 %v2897_v38, %v2069_v43 }
 0x687   : > { %2103 = vst [vmem:[%s3598_s24 + $0x20] sm:$0xff] %v2070_v44 }
 0x68c   : > { %v2071_v45 = vpop.f32.mrf.mxu1 }
 0x68d   : > { %v2072_v4 = vadd.f32 %v2897_v38, %v2071_v45 }
 0x68f   : > { %2104 = vst [vmem:[%s3598_s24 + $0x28] sm:$0xff] %v2072_v4 }
 0x694   : > { %v2074_v40 = vpop.f32.mrf.mxu1 }
 0x695   : > { %v2075_v13 = vadd.f32 %v2897_v38, %v2074_v40 }
 0x697   : > { %2105 = vst [vmem:[%s3598_s24 + $0x30] sm:$0xff] %v2075_v13 }
 0x69c   : > { %v2076_v46 = vpop.f32.mrf.mxu1 }
 0x69d   : > { %v2077_v47 = vadd.f32 %v2897_v38, %v2076_v46 }
 0x69f   : > { %2106 = vst [vmem:[%s3598_s24 + $0x38] sm:$0xff] %v2077_v47 }
 0x6a4   : > { %v2079_v8 = vpop.f32.mrf.mxu1 }
 0x6a5   : > { %v2080_v48 = vadd.f32 %v2897_v38, %v2079_v8 }
 0x6a7   : > { %2107 = vst [vmem:[%s3598_s24 + $0x40] sm:$0xff] %v2080_v48 }
 0x6ac   : > { %v2081_v49 = vpop.f32.mrf.mxu1 }
 0x6ad   : > { %v2082_v50 = vadd.f32 %v2897_v38, %v2081_v49 }
 0x6af   : > { %2108 = vst [vmem:[%s3598_s24 + $0x48] sm:$0xff] %v2082_v50 }
 0x6b4   : > { %v2084_v41 = vpop.f32.mrf.mxu1 }
 0x6b5   : > { %v2085_v51 = vadd.f32 %v2897_v38, %v2084_v41 }
 0x6b7   : > { %2109 = vst [vmem:[%s3598_s24 + $0x50] sm:$0xff] %v2085_v51 }
 0x6bc   : > { %v2086_v52 = vpop.f32.mrf.mxu1 }
 0x6bd   : > { %v2087_v53 = vadd.f32 %v2897_v38, %v2086_v52 }
 0x6bf   : > { %2110 = vst [vmem:[%s3598_s24 + $0x58] sm:$0xff] %v2087_v53 }
 0x6c4   : > { %v2089_v54 = vpop.f32.mrf.mxu1 }
 0x6c5   : > { %v2090_v55 = vadd.f32 %v2897_v38, %v2089_v54 }
 0x6c7   : > { %2111 = vst [vmem:[%s3598_s24 + $0x60] sm:$0xff] %v2090_v55 }
 0x6cc   : > { %v2091_v56 = vpop.f32.mrf.mxu1 }
 0x6cd   : > { %v2092_v62 = vadd.f32 %v2897_v38, %v2091_v56 }
 0x6cf   : > { %2112 = vst [vmem:[%s3598_s24 + $0x68] sm:$0xff] %v2092_v62 }
 0x6d4   : > { %v2094_v0 = vpop.f32.mrf.mxu1 }
 0x6d5   : > { %v2095_v1 = vadd.f32 %v2897_v38, %v2094_v0 }
 0x6d7   : > { %2113 = vst [vmem:[%s3598_s24 + $0x70] sm:$0xff] %v2095_v1 }
 0x6dc   : > { %v2096_v2 = vpop.f32.mrf.mxu1 }
 0x6dd   : > { %v2097_v3 = vadd.f32 %v2897_v38, %v2096_v2 }
 0x6df   : > { %2114 = vst [vmem:[%s3598_s24 + $0x78] sm:$0xff] %v2097_v3 }
 0x6e0 PF: > { %s30_s18 = sadd.s32 1, %s3164_s18  }
 0x6e1   : > { %p27_p7 = scmp.ge.s32.totalorder %s30_s18, 4  }
 0x6e3   :  { %29 = sbr.rel (!%p27_p7) target bundleno = 10 (0xa), region = 149 }
 0x6e8   :  { %2137 = vsyncpa [#allocation4], 1 }
 0x6e9   :  { %2139 = vsyncpa [#allocation4 + $0x1], 1 }
 0x6ea   :  { %2140 = vsyncpa [#allocation6], 1 }
 0x6eb   :  { %2141 = vsyncpa [#allocation9], 1 }
 0x6ec   :  { %2142 = vsyncpa [#allocation12], 1 }
 0x6ed   :  { %2143 = vsyncpa [#allocation15], 1 }

</bundles_post_ra>
